<compile_context>
chip_gen: v7x
topology: tpu7x:2x2x1
jax: 0.10.0
libtpu: 0.0.40
codegen_flags: <defaults>
</compile_context>

<pallas_src>
import jax
import jax.numpy as jnp
from jax.experimental import pallas as pl
from jax.experimental.pallas import tpu as pltpu

_LANE = 128

# Compat shim for older jax spellings of the Mosaic compiler-params class.
_COMPILER_PARAMS = getattr(pltpu, "CompilerParams", None) or getattr(
    pltpu, "TPUCompilerParams")


def _round_up(x, m):
    return (x + m - 1) // m * m


def _cdiv(a, b):
    return (a + b - 1) // b


def _tpu_hw():
    """Best-effort TPU-generation detection with safe fallbacks."""
    kind = ""
    try:
        kind = jax.devices()[0].device_kind.lower()
    except Exception:
        pass
    is_v5e = ("v5e" in kind) or ("v5 lite" in kind) or ("v5litepod" in kind)
    is_v7 = "v7" in kind
    mxu_rows = 128 if is_v5e else 256          # v5e: 4x128^2 MXU; v6e/v7x: 2x256^2
    num_cores = 2 if is_v7 else 1              # v7x: 2 TensorCores per chip
    try:
        vmem_cap = int(pltpu.get_tpu_info().vmem_capacity_bytes)
    except Exception:
        vmem_cap = (64 << 20) if is_v7 else (128 << 20)
    # Per-TensorCore ceiling for vmem_limit_bytes, with headroom under physical.
    vmem_ceiling = min(vmem_cap, (48 << 20) if is_v7 else (100 << 20))
    return {"kind": kind, "mxu_rows": mxu_rows, "num_cores": num_cores,
            "vmem_ceiling": vmem_ceiling}


def _pad_feature_dim(d, mxu_rows):
    # Lane-dense 128 padding for small dims; larger dims align to the MXU row
    # dimension (256 on v6e/v7x) so remainder passes don't idle half the array.
    if d <= _LANE:
        return _LANE
    return _round_up(d, mxu_rows if mxu_rows > _LANE else _LANE)


def prepare_params(params, *, compute_dtype=jnp.bfloat16, hw=None):
    """One-time prep: zero-pad feature dims (lane/MXU-dense) and pre-cast weights.

    Cache the returned dict and reuse it across forward calls -- this hoists the
    ~13 per-call pad/cast XLA ops (and their HBM traffic) out of the forward.
    params: 6 pairs of (W [in, out] f32, b [1, out] f32).
    """
    hw = hw or _tpu_hw()
    dims = [params[0][0].shape[0]] + [w.shape[1] for (w, _) in params]
    pdims = [_pad_feature_dim(d, hw["mxu_rows"]) for d in dims]
    flat = []
    for li, (w, b) in enumerate(params):
        w_p = jnp.zeros((pdims[li], pdims[li + 1]), compute_dtype)
        w_p = w_p.at[:dims[li], :dims[li + 1]].set(w.astype(compute_dtype))
        b_p = jnp.zeros((1, pdims[li + 1]), jnp.float32)
        b_p = b_p.at[:, :dims[li + 1]].set(b.reshape(1, -1).astype(jnp.float32))
        flat.extend([w_p, b_p])
    return {"flat": tuple(flat), "dims": tuple(dims), "pdims": tuple(pdims),
            "compute_dtype": jnp.dtype(compute_dtype), "hw": hw}


def _mlp_kernel(x_ref,
                w1_ref, b1_ref, w2_ref, b2_ref, w3_ref, b3_ref,
                w4_ref, b4_ref, w5_ref, b5_ref, w6_ref, b6_ref,
                o_ref):
    """Whole 6-layer forward for one batch tile; padded weights resident in VMEM.

    Matmuls run in the weights' dtype with f32 MXU accumulation; bias add and
    ReLU stay f32; the inter-layer activation is carried in the compute dtype.
    """
    h = x_ref[...]
    for w_ref, b_ref in ((w1_ref, b1_ref), (w2_ref, b2_ref), (w3_ref, b3_ref),
                         (w4_ref, b4_ref), (w5_ref, b5_ref)):
        acc = jnp.dot(h, w_ref[...], preferred_element_type=jnp.float32)
        h = jnp.maximum(acc + b_ref[...], 0.0).astype(w_ref.dtype)
    out = jnp.dot(h, w6_ref[...], preferred_element_type=jnp.float32) + b6_ref[...]
    o_ref[...] = out.astype(o_ref.dtype)


def five_layer_relu_forward(x, prepared, *, single_buffer_weights=True):
    """x: [B, c_in] float32. prepared: output of prepare_params (cached)."""
    dims, pdims = prepared["dims"], prepared["pdims"]
    hw = prepared["hw"]
    cdt = prepared["compute_dtype"]
    flat = prepared["flat"]

    B, c_in = x.shape
    assert c_in == dims[0], (c_in, dims[0])
    c_out = dims[-1]

    in_item = cdt.itemsize
    act_sub = 8 if in_item >= 4 else 32 // in_item   # native sublanes: f32=8, bf16=16

    # ---- VMEM budget & batch-tile ceiling (generation aware) ---------------
    w_factor = 1 if single_buffer_weights else 2
    weights_bytes = sum(pdims[i] * pdims[i + 1] * in_item      # weights
                        + 8 * pdims[i + 1] * 4                 # bias (sublane-padded)
                        for i in range(6))
    row_bytes = 2 * (pdims[0] * in_item + pdims[-1] * 4)       # double-buffered x/out rows
    headroom = 4 << 20
    avail = hw["vmem_ceiling"] - headroom - w_factor * weights_bytes
    max_tile = max(avail // row_bytes, act_sub) if avail > 0 else act_sub
    max_tile = min(max_tile, 2048)
    if max_tile >= hw["mxu_rows"]:
        max_tile = (max_tile // hw["mxu_rows"]) * hw["mxu_rows"]
    else:
        max_tile = max((max_tile // act_sub) * act_sub, act_sub)

    # ---- Batch tiling -------------------------------------------------------
    B_pad = _round_up(B, act_sub)
    if hw["num_cores"] >= 2 and B_pad >= 2 * act_sub:
        # v7x: never collapse to grid=(1,); give each TensorCore a batch tile.
        per_core = _round_up(_cdiv(B_pad, hw["num_cores"]), act_sub)
        batch_tile = max(min(per_core, max_tile), act_sub)
    else:
        batch_tile = max(min(B_pad, max_tile), act_sub)
    grid_n = _cdiv(B_pad, batch_tile)
    B_total = grid_n * batch_tile

    # Activation pad + cast (per call; weights were prepared once).
    x_p = jnp.zeros((B_total, pdims[0]), cdt).at[:B, :c_in].set(x.astype(cdt))

    flops = 2 * B_total * sum(pdims[i] * pdims[i + 1] for i in range(6))
    bytes_accessed = (B_total * pdims[0] * in_item
                      + sum(int(a.size) * a.dtype.itemsize for a in flat)
                      + B_total * pdims[-1] * 4)
    vmem_budget = (w_factor * weights_bytes
                   + 2 * batch_tile * (pdims[0] * in_item + pdims[-1] * 4)
                   + headroom)
    vmem_budget = int(min(max(vmem_budget, 16 << 20), hw["vmem_ceiling"]))

    def _call(single_buffer):
        wkw = {"pipeline_mode": pl.Buffered(1)} if single_buffer else {}
        in_specs = [pl.BlockSpec((batch_tile, pdims[0]), lambda i: (i, 0))]
        for li in range(6):
            w_p, b_p = flat[2 * li], flat[2 * li + 1]
            # Constant (0,0) index_map: the block never changes across the grid,
            # so the resident copy is reused; Buffered(1) drops the 2nd buffer.
            in_specs.append(pl.BlockSpec(w_p.shape, lambda i: (0, 0), **wkw))
            in_specs.append(pl.BlockSpec(b_p.shape, lambda i: (0, 0), **wkw))
        out_spec = pl.BlockSpec((batch_tile, pdims[-1]), lambda i: (i, 0))
        return pl.pallas_call(
            _mlp_kernel,
            out_shape=jax.ShapeDtypeStruct((B_total, pdims[-1]), jnp.float32),
            grid_spec=pltpu.PrefetchScalarGridSpec(
                num_scalar_prefetch=0,
                grid=(grid_n,),
                in_specs=in_specs,
                out_specs=out_spec,
            ),
            compiler_params=_COMPILER_PARAMS(
                dimension_semantics=("parallel",) if grid_n > 1 else ("arbitrary",),
                vmem_limit_bytes=vmem_budget,
            ),
            cost_estimate=pl.CostEstimate(flops=int(flops), transcendentals=0,
                                          bytes_accessed=int(bytes_accessed)),
        )(x_p, *flat)

    if single_buffer_weights:
        try:
            out_p = _call(True)
        except Exception:
            # This jax build rejects pipeline_mode=pl.Buffered(1) -> default buffering.
            out_p = _call(False)
    else:
        out_p = _call(False)

    # Slice away batch / lane padding.
    return out_p[:B, :c_out]


def init_linear_params(key, fan_in, fan_out):
    """Match torch.nn.Linear default init: U(-1/sqrt(fan_in), 1/sqrt(fan_in))."""
    kw, kb = jax.random.split(key)
    bound = 1.0 / (fan_in ** 0.5)
    w = jax.random.uniform(kw, (fan_in, fan_out), jnp.float32, -bound, bound)  # [in, out]
    b = jax.random.uniform(kb, (1, fan_out), jnp.float32, -bound, bound)
    return w, b


def reference_forward(x, params, compute_dtype=jnp.float32):
    """Pure-JAX reference with the kernel's cast scheme (f32 bias-add/ReLU epilogue)."""
    cdt = jnp.dtype(compute_dtype)
    h = x.astype(cdt)
    n = len(params)
    for i, (w, b) in enumerate(params):
        acc = jnp.dot(h, w.astype(cdt), preferred_element_type=jnp.float32) + b
        h = jnp.maximum(acc, 0.0).astype(cdt) if i < n - 1 else acc
    return h


if __name__ == "__main__":
    key = jax.random.PRNGKey(0)

    # c_in=32 -> 64 -> 48 -> 64 -> 32 -> 16 -> c_out=8
    dims = [32, 64, 48, 64, 32, 16, 8]
    B = 16

    keys = jax.random.split(key, len(dims))  # 1 key for x, 6 for layers
    x = jax.random.normal(keys[0], (B, dims[0]), jnp.float32)
    params = [init_linear_params(keys[i + 1], dims[i], dims[i + 1]) for i in range(6)]

    # f32 path: exact semantics of the original PyTorch module.
    prep_f32 = prepare_params(params, compute_dtype=jnp.float32)
    out_f32 = jax.block_until_ready(five_layer_relu_forward(x, prep_f32))
    ref_f32 = reference_forward(x, params, compute_dtype=jnp.float32)
    assert out_f32.shape == (B, dims[-1])
    assert jnp.allclose(out_f32, ref_f32, atol=1e-4, rtol=1e-4), "f32 mismatch vs reference"

    # bf16-operand / f32-accumulate path (default; MXU-friendly everywhere and
    # essential on v5e whose MXU is bf16-only).  prepare once, call many times.
    prep_bf16 = prepare_params(params)  # compute_dtype=bfloat16 (cached padded weights)
    out_bf16 = jax.block_until_ready(five_layer_relu_forward(x, prep_bf16))
    out_bf16_2 = jax.block_until_ready(five_layer_relu_forward(x, prep_bf16))  # cached reuse
    ref_bf16 = reference_forward(x, params, compute_dtype=jnp.bfloat16)
    assert out_bf16.shape == (B, dims[-1])
    assert jnp.allclose(out_bf16, ref_bf16, atol=5e-3, rtol=5e-3), "bf16 mismatch vs reference"
    assert jnp.allclose(out_bf16, out_bf16_2), "cached-params reuse mismatch"

    print("KERNEL_OK")
</pallas_src>

<mosaic_0001>
module attributes {stable_mosaic.version = 11 : i64} {
  func.func @_mlp_kernel(%arg0: i32, %arg1: memref<16x128xf32, #tpu.memory_space<vmem>>, %arg2: memref<128x128xf32, #tpu.memory_space<vmem>>, %arg3: memref<1x128xf32, #tpu.memory_space<vmem>>, %arg4: memref<128x128xf32, #tpu.memory_space<vmem>>, %arg5: memref<1x128xf32, #tpu.memory_space<vmem>>, %arg6: memref<128x128xf32, #tpu.memory_space<vmem>>, %arg7: memref<1x128xf32, #tpu.memory_space<vmem>>, %arg8: memref<128x128xf32, #tpu.memory_space<vmem>>, %arg9: memref<1x128xf32, #tpu.memory_space<vmem>>, %arg10: memref<128x128xf32, #tpu.memory_space<vmem>>, %arg11: memref<1x128xf32, #tpu.memory_space<vmem>>, %arg12: memref<128x128xf32, #tpu.memory_space<vmem>>, %arg13: memref<1x128xf32, #tpu.memory_space<vmem>>, %arg14: memref<16x128xf32, #tpu.memory_space<vmem>>) attributes {dimension_semantics = [#tpu.dimension_semantics<arbitrary>], iteration_bounds = array<i64: 1>, scalar_prefetch = 0 : i64, scratch_operands = 0 : i64, tpu.core_type = #tpu.core_type<tc>, window_params = [{transform_indices = @transform_0, window_bounds = array<i64: 16, 128>}, {pipeline_mode = #tpu.pipeline_mode<synchronous>, transform_indices = @transform_1, window_bounds = array<i64: 128, 128>}, {pipeline_mode = #tpu.pipeline_mode<synchronous>, transform_indices = @transform_2, window_bounds = array<i64: 1, 128>}, {pipeline_mode = #tpu.pipeline_mode<synchronous>, transform_indices = @transform_3, window_bounds = array<i64: 128, 128>}, {pipeline_mode = #tpu.pipeline_mode<synchronous>, transform_indices = @transform_4, window_bounds = array<i64: 1, 128>}, {pipeline_mode = #tpu.pipeline_mode<synchronous>, transform_indices = @transform_5, window_bounds = array<i64: 128, 128>}, {pipeline_mode = #tpu.pipeline_mode<synchronous>, transform_indices = @transform_6, window_bounds = array<i64: 1, 128>}, {pipeline_mode = #tpu.pipeline_mode<synchronous>, transform_indices = @transform_7, window_bounds = array<i64: 128, 128>}, {pipeline_mode = #tpu.pipeline_mode<synchronous>, transform_indices = @transform_8, window_bounds = array<i64: 1, 128>}, {pipeline_mode = #tpu.pipeline_mode<synchronous>, transform_indices = @transform_9, window_bounds = array<i64: 128, 128>}, {pipeline_mode = #tpu.pipeline_mode<synchronous>, transform_indices = @transform_10, window_bounds = array<i64: 1, 128>}, {pipeline_mode = #tpu.pipeline_mode<synchronous>, transform_indices = @transform_11, window_bounds = array<i64: 128, 128>}, {pipeline_mode = #tpu.pipeline_mode<synchronous>, transform_indices = @transform_12, window_bounds = array<i64: 1, 128>}, {transform_indices = @transform_13, window_bounds = array<i64: 16, 128>}]} {
    %c0 = arith.constant 0 : index
    %c0_0 = arith.constant 0 : index
    %0 = vector.load %arg1[%c0, %c0_0] : memref<16x128xf32, #tpu.memory_space<vmem>>, vector<16x128xf32>
    %c0_1 = arith.constant 0 : index
    %c0_2 = arith.constant 0 : index
    %1 = vector.load %arg2[%c0_1, %c0_2] : memref<128x128xf32, #tpu.memory_space<vmem>>, vector<128x128xf32>
    %cst = arith.constant dense<0.000000e+00> : vector<16x128xf32>
    %2 = tpu.matmul %0, %1, %cst {dimension_numbers = #tpu.dot_dimension_numbers<[1], [0], [0], [1], [0, 0, 1, 1], [], []>} : vector<16x128xf32>, vector<128x128xf32>, vector<16x128xf32> -> vector<16x128xf32>
    %c0_3 = arith.constant 0 : index
    %c0_4 = arith.constant 0 : index
    %3 = vector.load %arg3[%c0_3, %c0_4] : memref<1x128xf32, #tpu.memory_space<vmem>>, vector<1x128xf32>
    %4 = vector.broadcast %3 : vector<1x128xf32> to vector<16x128xf32>
    %5 = arith.addf %2, %4 : vector<16x128xf32>
    %cst_5 = arith.constant 0.000000e+00 : f32
    %6 = vector.broadcast %cst_5 : f32 to vector<16x128xf32>
    %7 = arith.maximumf %5, %6 : vector<16x128xf32>
    %c0_6 = arith.constant 0 : index
    %c0_7 = arith.constant 0 : index
    %8 = vector.load %arg4[%c0_6, %c0_7] : memref<128x128xf32, #tpu.memory_space<vmem>>, vector<128x128xf32>
    %cst_8 = arith.constant dense<0.000000e+00> : vector<16x128xf32>
    %9 = tpu.matmul %7, %8, %cst_8 {dimension_numbers = #tpu.dot_dimension_numbers<[1], [0], [0], [1], [0, 0, 1, 1], [], []>} : vector<16x128xf32>, vector<128x128xf32>, vector<16x128xf32> -> vector<16x128xf32>
    %c0_9 = arith.constant 0 : index
    %c0_10 = arith.constant 0 : index
    %10 = vector.load %arg5[%c0_9, %c0_10] : memref<1x128xf32, #tpu.memory_space<vmem>>, vector<1x128xf32>
    %11 = vector.broadcast %10 : vector<1x128xf32> to vector<16x128xf32>
    %12 = arith.addf %9, %11 : vector<16x128xf32>
    %cst_11 = arith.constant 0.000000e+00 : f32
    %13 = vector.broadcast %cst_11 : f32 to vector<16x128xf32>
    %14 = arith.maximumf %12, %13 : vector<16x128xf32>
    %c0_12 = arith.constant 0 : index
    %c0_13 = arith.constant 0 : index
    %15 = vector.load %arg6[%c0_12, %c0_13] : memref<128x128xf32, #tpu.memory_space<vmem>>, vector<128x128xf32>
    %cst_14 = arith.constant dense<0.000000e+00> : vector<16x128xf32>
    %16 = tpu.matmul %14, %15, %cst_14 {dimension_numbers = #tpu.dot_dimension_numbers<[1], [0], [0], [1], [0, 0, 1, 1], [], []>} : vector<16x128xf32>, vector<128x128xf32>, vector<16x128xf32> -> vector<16x128xf32>
    %c0_15 = arith.constant 0 : index
    %c0_16 = arith.constant 0 : index
    %17 = vector.load %arg7[%c0_15, %c0_16] : memref<1x128xf32, #tpu.memory_space<vmem>>, vector<1x128xf32>
    %18 = vector.broadcast %17 : vector<1x128xf32> to vector<16x128xf32>
    %19 = arith.addf %16, %18 : vector<16x128xf32>
    %cst_17 = arith.constant 0.000000e+00 : f32
    %20 = vector.broadcast %cst_17 : f32 to vector<16x128xf32>
    %21 = arith.maximumf %19, %20 : vector<16x128xf32>
    %c0_18 = arith.constant 0 : index
    %c0_19 = arith.constant 0 : index
    %22 = vector.load %arg8[%c0_18, %c0_19] : memref<128x128xf32, #tpu.memory_space<vmem>>, vector<128x128xf32>
    %cst_20 = arith.constant dense<0.000000e+00> : vector<16x128xf32>
    %23 = tpu.matmul %21, %22, %cst_20 {dimension_numbers = #tpu.dot_dimension_numbers<[1], [0], [0], [1], [0, 0, 1, 1], [], []>} : vector<16x128xf32>, vector<128x128xf32>, vector<16x128xf32> -> vector<16x128xf32>
    %c0_21 = arith.constant 0 : index
    %c0_22 = arith.constant 0 : index
    %24 = vector.load %arg9[%c0_21, %c0_22] : memref<1x128xf32, #tpu.memory_space<vmem>>, vector<1x128xf32>
    %25 = vector.broadcast %24 : vector<1x128xf32> to vector<16x128xf32>
    %26 = arith.addf %23, %25 : vector<16x128xf32>
    %cst_23 = arith.constant 0.000000e+00 : f32
    %27 = vector.broadcast %cst_23 : f32 to vector<16x128xf32>
    %28 = arith.maximumf %26, %27 : vector<16x128xf32>
    %c0_24 = arith.constant 0 : index
    %c0_25 = arith.constant 0 : index
    %29 = vector.load %arg10[%c0_24, %c0_25] : memref<128x128xf32, #tpu.memory_space<vmem>>, vector<128x128xf32>
    %cst_26 = arith.constant dense<0.000000e+00> : vector<16x128xf32>
    %30 = tpu.matmul %28, %29, %cst_26 {dimension_numbers = #tpu.dot_dimension_numbers<[1], [0], [0], [1], [0, 0, 1, 1], [], []>} : vector<16x128xf32>, vector<128x128xf32>, vector<16x128xf32> -> vector<16x128xf32>
    %c0_27 = arith.constant 0 : index
    %c0_28 = arith.constant 0 : index
    %31 = vector.load %arg11[%c0_27, %c0_28] : memref<1x128xf32, #tpu.memory_space<vmem>>, vector<1x128xf32>
    %32 = vector.broadcast %31 : vector<1x128xf32> to vector<16x128xf32>
    %33 = arith.addf %30, %32 : vector<16x128xf32>
    %cst_29 = arith.constant 0.000000e+00 : f32
    %34 = vector.broadcast %cst_29 : f32 to vector<16x128xf32>
    %35 = arith.maximumf %33, %34 : vector<16x128xf32>
    %c0_30 = arith.constant 0 : index
    %c0_31 = arith.constant 0 : index
    %36 = vector.load %arg12[%c0_30, %c0_31] : memref<128x128xf32, #tpu.memory_space<vmem>>, vector<128x128xf32>
    %cst_32 = arith.constant dense<0.000000e+00> : vector<16x128xf32>
    %37 = tpu.matmul %35, %36, %cst_32 {dimension_numbers = #tpu.dot_dimension_numbers<[1], [0], [0], [1], [0, 0, 1, 1], [], []>} : vector<16x128xf32>, vector<128x128xf32>, vector<16x128xf32> -> vector<16x128xf32>
    %c0_33 = arith.constant 0 : index
    %c0_34 = arith.constant 0 : index
    %38 = vector.load %arg13[%c0_33, %c0_34] : memref<1x128xf32, #tpu.memory_space<vmem>>, vector<1x128xf32>
    %39 = vector.broadcast %38 : vector<1x128xf32> to vector<16x128xf32>
    %40 = arith.addf %37, %39 : vector<16x128xf32>
    %c0_35 = arith.constant 0 : index
    %c0_36 = arith.constant 0 : index
    %41 = vector.load %arg14[%c0_35, %c0_36] : memref<16x128xf32, #tpu.memory_space<vmem>>, vector<16x128xf32>
    tpu.vector_store %arg14[%c0_35, %c0_36], %40 {strides = array<i32>} : memref<16x128xf32, #tpu.memory_space<vmem>>, vector<16x128xf32>,
    return
  }
  func.func @transform_0(%arg0: i32) -> (i32, i32) {
    %c0_i32 = arith.constant 0 : i32
    %c0_i32_0 = arith.constant 0 : i32
    return %arg0, %c0_i32 : i32, i32
  }
  func.func @transform_1(%arg0: i32) -> (i32, i32) {
    %c0_i32 = arith.constant 0 : i32
    %c0_i32_0 = arith.constant 0 : i32
    %c0_i32_1 = arith.constant 0 : i32
    return %c0_i32, %c0_i32_0 : i32, i32
  }
  func.func @transform_2(%arg0: i32) -> (i32, i32) {
    %c0_i32 = arith.constant 0 : i32
    %c0_i32_0 = arith.constant 0 : i32
    %c0_i32_1 = arith.constant 0 : i32
    return %c0_i32, %c0_i32_0 : i32, i32
  }
  func.func @transform_3(%arg0: i32) -> (i32, i32) {
    %c0_i32 = arith.constant 0 : i32
    %c0_i32_0 = arith.constant 0 : i32
    %c0_i32_1 = arith.constant 0 : i32
    return %c0_i32, %c0_i32_0 : i32, i32
  }
  func.func @transform_4(%arg0: i32) -> (i32, i32) {
    %c0_i32 = arith.constant 0 : i32
    %c0_i32_0 = arith.constant 0 : i32
    %c0_i32_1 = arith.constant 0 : i32
    return %c0_i32, %c0_i32_0 : i32, i32
  }
  func.func @transform_5(%arg0: i32) -> (i32, i32) {
    %c0_i32 = arith.constant 0 : i32
    %c0_i32_0 = arith.constant 0 : i32
    %c0_i32_1 = arith.constant 0 : i32
    return %c0_i32, %c0_i32_0 : i32, i32
  }
  func.func @transform_6(%arg0: i32) -> (i32, i32) {
    %c0_i32 = arith.constant 0 : i32
    %c0_i32_0 = arith.constant 0 : i32
    %c0_i32_1 = arith.constant 0 : i32
    return %c0_i32, %c0_i32_0 : i32, i32
  }
  func.func @transform_7(%arg0: i32) -> (i32, i32) {
    %c0_i32 = arith.constant 0 : i32
    %c0_i32_0 = arith.constant 0 : i32
    %c0_i32_1 = arith.constant 0 : i32
    return %c0_i32, %c0_i32_0 : i32, i32
  }
  func.func @transform_8(%arg0: i32) -> (i32, i32) {
    %c0_i32 = arith.constant 0 : i32
    %c0_i32_0 = arith.constant 0 : i32
    %c0_i32_1 = arith.constant 0 : i32
    return %c0_i32, %c0_i32_0 : i32, i32
  }
  func.func @transform_9(%arg0: i32) -> (i32, i32) {
    %c0_i32 = arith.constant 0 : i32
    %c0_i32_0 = arith.constant 0 : i32
    %c0_i32_1 = arith.constant 0 : i32
    return %c0_i32, %c0_i32_0 : i32, i32
  }
  func.func @transform_10(%arg0: i32) -> (i32, i32) {
    %c0_i32 = arith.constant 0 : i32
    %c0_i32_0 = arith.constant 0 : i32
    %c0_i32_1 = arith.constant 0 : i32
    return %c0_i32, %c0_i32_0 : i32, i32
  }
  func.func @transform_11(%arg0: i32) -> (i32, i32) {
    %c0_i32 = arith.constant 0 : i32
    %c0_i32_0 = arith.constant 0 : i32
    %c0_i32_1 = arith.constant 0 : i32
    return %c0_i32, %c0_i32_0 : i32, i32
  }
  func.func @transform_12(%arg0: i32) -> (i32, i32) {
    %c0_i32 = arith.constant 0 : i32
    %c0_i32_0 = arith.constant 0 : i32
    %c0_i32_1 = arith.constant 0 : i32
    return %c0_i32, %c0_i32_0 : i32, i32
  }
  func.func @transform_13(%arg0: i32) -> (i32, i32) {
    %c0_i32 = arith.constant 0 : i32
    %c0_i32_0 = arith.constant 0 : i32
    return %arg0, %c0_i32 : i32, i32
  }
}

module attributes {stable_mosaic.version = 11 : i64} {
  func.func @_mlp_kernel(%arg0: i32, %arg1: memref<16x128xf32, #tpu.memory_space<vmem>>, %arg2: memref<128x128xf32, #tpu.memory_space<vmem>>, %arg3: memref<1x128xf32, #tpu.memory_space<vmem>>, %arg4: memref<128x128xf32, #tpu.memory_space<vmem>>, %arg5: memref<1x128xf32, #tpu.memory_space<vmem>>, %arg6: memref<128x128xf32, #tpu.memory_space<vmem>>, %arg7: memref<1x128xf32, #tpu.memory_space<vmem>>, %arg8: memref<128x128xf32, #tpu.memory_space<vmem>>, %arg9: memref<1x128xf32, #tpu.memory_space<vmem>>, %arg10: memref<128x128xf32, #tpu.memory_space<vmem>>, %arg11: memref<1x128xf32, #tpu.memory_space<vmem>>, %arg12: memref<128x128xf32, #tpu.memory_space<vmem>>, %arg13: memref<1x128xf32, #tpu.memory_space<vmem>>, %arg14: memref<16x128xf32, #tpu.memory_space<vmem>>) attributes {dimension_semantics = [#tpu.dimension_semantics<arbitrary>], iteration_bounds = array<i64: 1>, scalar_prefetch = 0 : i64, scratch_operands = 0 : i64, tpu.core_type = #tpu.core_type<tc>, window_params = [{transform_indices = @transform_0, window_bounds = array<i64: 16, 128>}, {pipeline_mode = #tpu.pipeline_mode<synchronous>, transform_indices = @transform_1, window_bounds = array<i64: 128, 128>}, {pipeline_mode = #tpu.pipeline_mode<synchronous>, transform_indices = @transform_2, window_bounds = array<i64: 1, 128>}, {pipeline_mode = #tpu.pipeline_mode<synchronous>, transform_indices = @transform_3, window_bounds = array<i64: 128, 128>}, {pipeline_mode = #tpu.pipeline_mode<synchronous>, transform_indices = @transform_4, window_bounds = array<i64: 1, 128>}, {pipeline_mode = #tpu.pipeline_mode<synchronous>, transform_indices = @transform_5, window_bounds = array<i64: 128, 128>}, {pipeline_mode = #tpu.pipeline_mode<synchronous>, transform_indices = @transform_6, window_bounds = array<i64: 1, 128>}, {pipeline_mode = #tpu.pipeline_mode<synchronous>, transform_indices = @transform_7, window_bounds = array<i64: 128, 128>}, {pipeline_mode = #tpu.pipeline_mode<synchronous>, transform_indices = @transform_8, window_bounds = array<i64: 1, 128>}, {pipeline_mode = #tpu.pipeline_mode<synchronous>, transform_indices = @transform_9, window_bounds = array<i64: 128, 128>}, {pipeline_mode = #tpu.pipeline_mode<synchronous>, transform_indices = @transform_10, window_bounds = array<i64: 1, 128>}, {pipeline_mode = #tpu.pipeline_mode<synchronous>, transform_indices = @transform_11, window_bounds = array<i64: 128, 128>}, {pipeline_mode = #tpu.pipeline_mode<synchronous>, transform_indices = @transform_12, window_bounds = array<i64: 1, 128>}, {transform_indices = @transform_13, window_bounds = array<i64: 16, 128>}]} {
    %c0 = arith.constant 0 : index
    %c0_0 = arith.constant 0 : index
    %0 = vector.load %arg1[%c0, %c0_0] : memref<16x128xf32, #tpu.memory_space<vmem>>, vector<16x128xf32>
    %c0_1 = arith.constant 0 : index
    %c0_2 = arith.constant 0 : index
    %1 = vector.load %arg2[%c0_1, %c0_2] : memref<128x128xf32, #tpu.memory_space<vmem>>, vector<128x128xf32>
    %cst = arith.constant dense<0.000000e+00> : vector<16x128xf32>
    %2 = tpu.matmul %0, %1, %cst {dimension_numbers = #tpu.dot_dimension_numbers<[1], [0], [0], [1], [0, 0, 1, 1], [], []>} : vector<16x128xf32>, vector<128x128xf32>, vector<16x128xf32> -> vector<16x128xf32>
    %c0_3 = arith.constant 0 : index
    %c0_4 = arith.constant 0 : index
    %3 = vector.load %arg3[%c0_3, %c0_4] : memref<1x128xf32, #tpu.memory_space<vmem>>, vector<1x128xf32>
    %4 = vector.broadcast %3 : vector<1x128xf32> to vector<16x128xf32>
    %5 = arith.addf %2, %4 : vector<16x128xf32>
    %cst_5 = arith.constant 0.000000e+00 : f32
    %6 = vector.broadcast %cst_5 : f32 to vector<16x128xf32>
    %7 = arith.maximumf %5, %6 : vector<16x128xf32>
    %c0_6 = arith.constant 0 : index
    %c0_7 = arith.constant 0 : index
    %8 = vector.load %arg4[%c0_6, %c0_7] : memref<128x128xf32, #tpu.memory_space<vmem>>, vector<128x128xf32>
    %cst_8 = arith.constant dense<0.000000e+00> : vector<16x128xf32>
    %9 = tpu.matmul %7, %8, %cst_8 {dimension_numbers = #tpu.dot_dimension_numbers<[1], [0], [0], [1], [0, 0, 1, 1], [], []>} : vector<16x128xf32>, vector<128x128xf32>, vector<16x128xf32> -> vector<16x128xf32>
    %c0_9 = arith.constant 0 : index
    %c0_10 = arith.constant 0 : index
    %10 = vector.load %arg5[%c0_9, %c0_10] : memref<1x128xf32, #tpu.memory_space<vmem>>, vector<1x128xf32>
    %11 = vector.broadcast %10 : vector<1x128xf32> to vector<16x128xf32>
    %12 = arith.addf %9, %11 : vector<16x128xf32>
    %cst_11 = arith.constant 0.000000e+00 : f32
    %13 = vector.broadcast %cst_11 : f32 to vector<16x128xf32>
    %14 = arith.maximumf %12, %13 : vector<16x128xf32>
    %c0_12 = arith.constant 0 : index
    %c0_13 = arith.constant 0 : index
    %15 = vector.load %arg6[%c0_12, %c0_13] : memref<128x128xf32, #tpu.memory_space<vmem>>, vector<128x128xf32>
    %cst_14 = arith.constant dense<0.000000e+00> : vector<16x128xf32>
    %16 = tpu.matmul %14, %15, %cst_14 {dimension_numbers = #tpu.dot_dimension_numbers<[1], [0], [0], [1], [0, 0, 1, 1], [], []>} : vector<16x128xf32>, vector<128x128xf32>, vector<16x128xf32> -> vector<16x128xf32>
    %c0_15 = arith.constant 0 : index
    %c0_16 = arith.constant 0 : index
    %17 = vector.load %arg7[%c0_15, %c0_16] : memref<1x128xf32, #tpu.memory_space<vmem>>, vector<1x128xf32>
    %18 = vector.broadcast %17 : vector<1x128xf32> to vector<16x128xf32>
    %19 = arith.addf %16, %18 : vector<16x128xf32>
    %cst_17 = arith.constant 0.000000e+00 : f32
    %20 = vector.broadcast %cst_17 : f32 to vector<16x128xf32>
    %21 = arith.maximumf %19, %20 : vector<16x128xf32>
    %c0_18 = arith.constant 0 : index
    %c0_19 = arith.constant 0 : index
    %22 = vector.load %arg8[%c0_18, %c0_19] : memref<128x128xf32, #tpu.memory_space<vmem>>, vector<128x128xf32>
    %cst_20 = arith.constant dense<0.000000e+00> : vector<16x128xf32>
    %23 = tpu.matmul %21, %22, %cst_20 {dimension_numbers = #tpu.dot_dimension_numbers<[1], [0], [0], [1], [0, 0, 1, 1], [], []>} : vector<16x128xf32>, vector<128x128xf32>, vector<16x128xf32> -> vector<16x128xf32>
    %c0_21 = arith.constant 0 : index
    %c0_22 = arith.constant 0 : index
    %24 = vector.load %arg9[%c0_21, %c0_22] : memref<1x128xf32, #tpu.memory_space<vmem>>, vector<1x128xf32>
    %25 = vector.broadcast %24 : vector<1x128xf32> to vector<16x128xf32>
    %26 = arith.addf %23, %25 : vector<16x128xf32>
    %cst_23 = arith.constant 0.000000e+00 : f32
    %27 = vector.broadcast %cst_23 : f32 to vector<16x128xf32>
    %28 = arith.maximumf %26, %27 : vector<16x128xf32>
    %c0_24 = arith.constant 0 : index
    %c0_25 = arith.constant 0 : index
    %29 = vector.load %arg10[%c0_24, %c0_25] : memref<128x128xf32, #tpu.memory_space<vmem>>, vector<128x128xf32>
    %cst_26 = arith.constant dense<0.000000e+00> : vector<16x128xf32>
    %30 = tpu.matmul %28, %29, %cst_26 {dimension_numbers = #tpu.dot_dimension_numbers<[1], [0], [0], [1], [0, 0, 1, 1], [], []>} : vector<16x128xf32>, vector<128x128xf32>, vector<16x128xf32> -> vector<16x128xf32>
    %c0_27 = arith.constant 0 : index
    %c0_28 = arith.constant 0 : index
    %31 = vector.load %arg11[%c0_27, %c0_28] : memref<1x128xf32, #tpu.memory_space<vmem>>, vector<1x128xf32>
    %32 = vector.broadcast %31 : vector<1x128xf32> to vector<16x128xf32>
    %33 = arith.addf %30, %32 : vector<16x128xf32>
    %cst_29 = arith.constant 0.000000e+00 : f32
    %34 = vector.broadcast %cst_29 : f32 to vector<16x128xf32>
    %35 = arith.maximumf %33, %34 : vector<16x128xf32>
    %c0_30 = arith.constant 0 : index
    %c0_31 = arith.constant 0 : index
    %36 = vector.load %arg12[%c0_30, %c0_31] : memref<128x128xf32, #tpu.memory_space<vmem>>, vector<128x128xf32>
    %cst_32 = arith.constant dense<0.000000e+00> : vector<16x128xf32>
    %37 = tpu.matmul %35, %36, %cst_32 {dimension_numbers = #tpu.dot_dimension_numbers<[1], [0], [0], [1], [0, 0, 1, 1], [], []>} : vector<16x128xf32>, vector<128x128xf32>, vector<16x128xf32> -> vector<16x128xf32>
    %c0_33 = arith.constant 0 : index
    %c0_34 = arith.constant 0 : index
    %38 = vector.load %arg13[%c0_33, %c0_34] : memref<1x128xf32, #tpu.memory_space<vmem>>, vector<1x128xf32>
    %39 = vector.broadcast %38 : vector<1x128xf32> to vector<16x128xf32>
    %40 = arith.addf %37, %39 : vector<16x128xf32>
    %c0_35 = arith.constant 0 : index
    %c0_36 = arith.constant 0 : index
    %41 = vector.load %arg14[%c0_35, %c0_36] : memref<16x128xf32, #tpu.memory_space<vmem>>, vector<16x128xf32>
    tpu.vector_store %arg14[%c0_35, %c0_36], %40 {strides = array<i32>} : memref<16x128xf32, #tpu.memory_space<vmem>>, vector<16x128xf32>,
    return
  }
  func.func @transform_0(%arg0: i32) -> (i32, i32) {
    %c0_i32 = arith.constant 0 : i32
    %c0_i32_0 = arith.constant 0 : i32
    return %arg0, %c0_i32 : i32, i32
  }
  func.func @transform_1(%arg0: i32) -> (i32, i32) {
    %c0_i32 = arith.constant 0 : i32
    %c0_i32_0 = arith.constant 0 : i32
    %c0_i32_1 = arith.constant 0 : i32
    return %c0_i32, %c0_i32_0 : i32, i32
  }
  func.func @transform_2(%arg0: i32) -> (i32, i32) {
    %c0_i32 = arith.constant 0 : i32
    %c0_i32_0 = arith.constant 0 : i32
    %c0_i32_1 = arith.constant 0 : i32
    return %c0_i32, %c0_i32_0 : i32, i32
  }
  func.func @transform_3(%arg0: i32) -> (i32, i32) {
    %c0_i32 = arith.constant 0 : i32
    %c0_i32_0 = arith.constant 0 : i32
    %c0_i32_1 = arith.constant 0 : i32
    return %c0_i32, %c0_i32_0 : i32, i32
  }
  func.func @transform_4(%arg0: i32) -> (i32, i32) {
    %c0_i32 = arith.constant 0 : i32
    %c0_i32_0 = arith.constant 0 : i32
    %c0_i32_1 = arith.constant 0 : i32
    return %c0_i32, %c0_i32_0 : i32, i32
  }
  func.func @transform_5(%arg0: i32) -> (i32, i32) {
    %c0_i32 = arith.constant 0 : i32
    %c0_i32_0 = arith.constant 0 : i32
    %c0_i32_1 = arith.constant 0 : i32
    return %c0_i32, %c0_i32_0 : i32, i32
  }
  func.func @transform_6(%arg0: i32) -> (i32, i32) {
    %c0_i32 = arith.constant 0 : i32
    %c0_i32_0 = arith.constant 0 : i32
    %c0_i32_1 = arith.constant 0 : i32
    return %c0_i32, %c0_i32_0 : i32, i32
  }
  func.func @transform_7(%arg0: i32) -> (i32, i32) {
    %c0_i32 = arith.constant 0 : i32
    %c0_i32_0 = arith.constant 0 : i32
    %c0_i32_1 = arith.constant 0 : i32
    return %c0_i32, %c0_i32_0 : i32, i32
  }
  func.func @transform_8(%arg0: i32) -> (i32, i32) {
    %c0_i32 = arith.constant 0 : i32
    %c0_i32_0 = arith.constant 0 : i32
    %c0_i32_1 = arith.constant 0 : i32
    return %c0_i32, %c0_i32_0 : i32, i32
  }
  func.func @transform_9(%arg0: i32) -> (i32, i32) {
    %c0_i32 = arith.constant 0 : i32
    %c0_i32_0 = arith.constant 0 : i32
    %c0_i32_1 = arith.constant 0 : i32
    return %c0_i32, %c0_i32_0 : i32, i32
  }
  func.func @transform_10(%arg0: i32) -> (i32, i32) {
    %c0_i32 = arith.constant 0 : i32
    %c0_i32_0 = arith.constant 0 : i32
    %c0_i32_1 = arith.constant 0 : i32
    return %c0_i32, %c0_i32_0 : i32, i32
  }
  func.func @transform_11(%arg0: i32) -> (i32, i32) {
    %c0_i32 = arith.constant 0 : i32
    %c0_i32_0 = arith.constant 0 : i32
    %c0_i32_1 = arith.constant 0 : i32
    return %c0_i32, %c0_i32_0 : i32, i32
  }
  func.func @transform_12(%arg0: i32) -> (i32, i32) {
    %c0_i32 = arith.constant 0 : i32
    %c0_i32_0 = arith.constant 0 : i32
    %c0_i32_1 = arith.constant 0 : i32
    return %c0_i32, %c0_i32_0 : i32, i32
  }
  func.func @transform_13(%arg0: i32) -> (i32, i32) {
    %c0_i32 = arith.constant 0 : i32
    %c0_i32_0 = arith.constant 0 : i32
    return %arg0, %c0_i32 : i32, i32
  }
}

</mosaic_0001>

<bundles_post_ra>
// kernel: tpu_custom_call.1
= control target key start
LH: loop header
LB: loop body
LE: loop exit
PB: predicated region body
PF: predicated region fallthrough
CT: control target
= control target key end

     0   :  { %18 = vsyncpa [#allocation3], 0  ;;  %s1713_s0 = inlined_call_operand.hbm [shape: f32[16,128], index: 0, kind: input, shape index: {}]   ;;  %s1714_s1 = inlined_call_operand.hbm [shape: f32[128,128], index: 1, kind: input, shape index: {}]   ;;  %s1715_s2 = inlined_call_operand.vmem [shape: f32[1,128], index: 2, kind: input, shape index: {}]   ;;  %s1716_s3 = inlined_call_operand.hbm [shape: f32[128,128], index: 3, kind: input, shape index: {}]   ;;  %s1717_s4 = inlined_call_operand.vmem [shape: f32[1,128], index: 4, kind: input, shape index: {}]   ;;  %s1718_s5 = inlined_call_operand.hbm [shape: f32[128,128], index: 5, kind: input, shape index: {}]   ;;  %s1719_s6 = inlined_call_operand.vmem [shape: f32[1,128], index: 6, kind: input, shape index: {}]   ;;  %s1720_s7 = inlined_call_operand.hbm [shape: f32[128,128], index: 7, kind: input, shape index: {}]   ;;  %s1721_s8 = inlined_call_operand.vmem [shape: f32[1,128], index: 8, kind: input, shape index: {}]   ;;  %s1722_s9 = inlined_call_operand.hbm [shape: f32[128,128], index: 9, kind: input, shape index: {}]   ;;  %s1723_s10 = inlined_call_operand.vmem [shape: f32[1,128], index: 10, kind: input, shape index: {}]   ;;  %s1724_s11 = inlined_call_operand.hbm [shape: f32[128,128], index: 11, kind: input, shape index: {}]   ;;  %s1725_s12 = inlined_call_operand.vmem [shape: f32[1,128], index: 12, kind: input, shape index: {}]   ;;  %s1726_s13 = inlined_call_operand.hbm [shape: f32[16,128], index: 13, kind: output, shape index: {}]  }
   0x1   :  { %19 = vsyncpa [#allocation6], 0 }
   0x2   :  { %20 = vsyncpa [#allocation9], 0 }
   0x3   :  { %21 = vsyncpa [#allocation12], 0 }
   0x4   :  { %22 = vsyncpa [#allocation4], 0  ;;  %s1474_s25 = smov [#allocation5]   ;;  %s1475_s27 = smov [#allocation8]  }
   0x5   :  { %s40_s26 = sshll.u32 %s1474_s25, 4  ;;  %s68_s28 = sshll.u32 %s1475_s27, 4  ;;  %s41_s26 = int_to_ptr.vmem [resolvable:$true] %s40_s26  ;;  %s1554_s28 = int_to_ptr.vmem [resolvable:$true] %s68_s28 }
   0x6   :  { %s1288_s14 = scalar_lea.hbm %s1714_s1, 2048 }
   0x7   :  { %p1289_p0 = scmp.ne.s32.totalorder %s1714_s1, %s1288_s14  ;;  %p1292_p1 = scmp.lt.u32.totalorder %s1288_s14, %s1714_s1 }
   0x9   :  { %p1294_p2 = pnand %p1292_p1, %p1289_p0 }
   0xb   :  { %1297 = shalt.err (!%p1294_p2)
}
   0xc   :  { %s1298_s19 = scalar_lea.vmem %s41_s26, 2048  ;;  %p1303_p4 = scmp.lt.s32.totalorder %s41_s26, %s41_s26 }
   0xd   :  { %p1299_p3 = scmp.ne.s32.totalorder %s41_s26, %s1298_s19  ;;  %p1304_p5 = scmp.lt.s32.totalorder %s1298_s19, %s1298_s19 }
   0xf   :  { %p1305_p6 = por %p1304_p5, %p1303_p4 }
  0x11   :  { %p1306_p7 = pnand %p1305_p6, %p1299_p3 }
  0x13   :  { %1309 = shalt.err (!%p1306_p7)
}
  0x14   :  { %s1476_s20 = smov 128   ;;  %s1477_s21 = smov 8  }
  0x15   :  { %46 = dma.hbm_to_vmem [thread:$0]  %s1714_s1, 2048, %s41_s26, [#allocation6], %s1476_s20, %s1476_s20, %s1477_s21  }
  0x16   :  { %s1310_s27 = scalar_lea.hbm %s1718_s5, 2048 }
  0x17   :  { %p1311_p8 = scmp.ne.s32.totalorder %s1718_s5, %s1310_s27  ;;  %p1314_p9 = scmp.lt.u32.totalorder %s1310_s27, %s1718_s5 }
  0x19   :  { %p1316_p10 = pnand %p1314_p9, %p1311_p8 }
  0x1b   :  { %1319 = shalt.err (!%p1316_p10)
}
  0x1c   :  { %s1320_s16 = scalar_lea.vmem %s1554_s28, 2048  ;;  %p1325_p12 = scmp.lt.s32.totalorder %s1554_s28, %s1554_s28 }
  0x1d   :  { %p1321_p11 = scmp.ne.s32.totalorder %s1554_s28, %s1320_s16  ;;  %p1326_p13 = scmp.lt.s32.totalorder %s1320_s16, %s1320_s16 }
  0x1f   :  { %p1327_p0 = por %p1326_p13, %p1325_p12 }
  0x21   :  { %p1328_p1 = pnand %p1327_p0, %p1321_p11 }
  0x23   :  { %1331 = shalt.err (!%p1328_p1)
}
  0x24   :  { %74 = dma.hbm_to_vmem [thread:$0]  %s1718_s5, 2048, %s1554_s28, [#allocation9], %s1476_s20, %s1476_s20, %s1477_s21  }
  0x25   :  { %s1478_s17 = smov [#allocation11]   ;;  %s1479_s19 = smov [#allocation2]  }
  0x26   :  { %s96_s18 = sshll.u32 %s1478_s17, 4  ;;  %s28_s22 = sshll.u32 %s1479_s19, 4  ;;  %s97_s18 = int_to_ptr.vmem [resolvable:$true] %s96_s18  ;;  %s1591_s22 = int_to_ptr.vmem [resolvable:$true] %s28_s22 }
  0x27   :  { %s1332_s25 = scalar_lea.hbm %s1722_s9, 2048 }
  0x28   :  { %p1333_p2 = scmp.ne.s32.totalorder %s1722_s9, %s1332_s25  ;;  %p1336_p3 = scmp.lt.u32.totalorder %s1332_s25, %s1722_s9 }
  0x2a   :  { %p1338_p4 = pnand %p1336_p3, %p1333_p2 }
  0x2c   :  { %1341 = shalt.err (!%p1338_p4)
}
  0x2d   :  { %s1342_s5 = scalar_lea.vmem %s97_s18, 2048  ;;  %p1347_p6 = scmp.lt.s32.totalorder %s97_s18, %s97_s18 }
  0x2e   :  { %p1343_p5 = scmp.ne.s32.totalorder %s97_s18, %s1342_s5  ;;  %p1348_p7 = scmp.lt.s32.totalorder %s1342_s5, %s1342_s5 }
  0x30   :  { %p1349_p8 = por %p1348_p7, %p1347_p6 }
  0x32   :  { %p1350_p9 = pnand %p1349_p8, %p1343_p5 }
  0x34   :  { %1353 = shalt.err (!%p1350_p9)
}
  0x35   :  { %102 = dma.hbm_to_vmem [thread:$0]  %s1722_s9, 2048, %s97_s18, [#allocation12], %s1476_s20, %s1476_s20, %s1477_s21  }
  0x36   :  { %s1354_s26 = scalar_lea.hbm %s1713_s0, 256 }
  0x37   :  { %p1355_p10 = scmp.ne.s32.totalorder %s1713_s0, %s1354_s26  ;;  %p1358_p11 = scmp.lt.u32.totalorder %s1354_s26, %s1713_s0 }
  0x39   :  { %p1360_p12 = pnand %p1358_p11, %p1355_p10 }
  0x3b   :  { %1363 = shalt.err (!%p1360_p12)
}
  0x3c   :  { %s1364_s25 = scalar_lea.vmem %s1591_s22, 256  ;;  %p1369_p0 = scmp.lt.s32.totalorder %s1591_s22, %s1591_s22 }
  0x3d   :  { %p1365_p13 = scmp.ne.s32.totalorder %s1591_s22, %s1364_s25  ;;  %p1370_p1 = scmp.lt.s32.totalorder %s1364_s25, %s1364_s25 }
  0x3f   :  { %p1371_p2 = por %p1370_p1, %p1369_p0 }
  0x41   :  { %p1372_p3 = pnand %p1371_p2, %p1365_p13 }
  0x43   :  { %1375 = shalt.err (!%p1372_p3)
}
  0x44   :  { %34 = dma.hbm_to_vmem [thread:$0]  %s1713_s0, 256, %s1591_s22, [#allocation3], %s1476_s20, %s1476_s20, %s1477_s21  }
  0x45   :  { %s1480_s27 = smov [#allocation7]   ;;  %s1481_s30 = smov [#allocation10]  }
  0x46   :  { %s54_s29 = sshll.u32 %s1480_s27, 4  ;;  %s82_s14 = sshll.u32 %s1481_s30, 4  ;;  %s55_s29 = int_to_ptr.vmem [resolvable:$true] %s54_s29  ;;  %s1628_s14 = int_to_ptr.vmem [resolvable:$true] %s82_s14 }
  0x47   :  { %s1376_s15 = scalar_lea.hbm %s1716_s3, 2048 }
  0x48   :  { %p1377_p4 = scmp.ne.s32.totalorder %s1716_s3, %s1376_s15  ;;  %p1380_p5 = scmp.lt.u32.totalorder %s1376_s15, %s1716_s3 }
  0x4a   :  { %p1382_p6 = pnand %p1380_p5, %p1377_p4 }
  0x4c   :  { %1385 = shalt.err (!%p1382_p6)
}
  0x4d   :  { %s1386_s0 = scalar_lea.vmem %s55_s29, 2048  ;;  %p1391_p8 = scmp.lt.s32.totalorder %s55_s29, %s55_s29 }
  0x4e   :  { %p1387_p7 = scmp.ne.s32.totalorder %s55_s29, %s1386_s0  ;;  %p1392_p9 = scmp.lt.s32.totalorder %s1386_s0, %s1386_s0 }
  0x50   :  { %p1393_p10 = por %p1392_p9, %p1391_p8 }
  0x52   :  { %p1394_p11 = pnand %p1393_p10, %p1387_p7 }
  0x54   :  { %1397 = shalt.err (!%p1394_p11)
}
  0x55   :  { %60 = dma.hbm_to_vmem [thread:$0]  %s1716_s3, 2048, %s55_s29, [#allocation6], %s1476_s20, %s1476_s20, %s1477_s21  }
  0x56   :  { %s1398_s25 = scalar_lea.hbm %s1720_s7, 2048 }
  0x57   :  { %p1399_p12 = scmp.ne.s32.totalorder %s1720_s7, %s1398_s25  ;;  %p1402_p13 = scmp.lt.u32.totalorder %s1398_s25, %s1720_s7 }
  0x59   :  { %p1404_p0 = pnand %p1402_p13, %p1399_p12 }
  0x5b   :  { %1407 = shalt.err (!%p1404_p0)
}
  0x5c   :  { %s1408_s5 = scalar_lea.vmem %s1628_s14, 2048  ;;  %p1413_p2 = scmp.lt.s32.totalorder %s1628_s14, %s1628_s14 }
  0x5d   :  { %p1409_p1 = scmp.ne.s32.totalorder %s1628_s14, %s1408_s5  ;;  %p1414_p3 = scmp.lt.s32.totalorder %s1408_s5, %s1408_s5 }
  0x5f   :  { %p1415_p4 = por %p1414_p3, %p1413_p2 }
  0x61   :  { %p1416_p5 = pnand %p1415_p4, %p1409_p1 }
  0x63   :  { %1419 = shalt.err (!%p1416_p5)
}
  0x64   :  { %88 = dma.hbm_to_vmem [thread:$0]  %s1720_s7, 2048, %s1628_s14, [#allocation9], %s1476_s20, %s1476_s20, %s1477_s21  }
  0x65   :  { %s1482_s28 = smov [#allocation13]   ;;  %s1420_s26 = scalar_lea.hbm %s1724_s11, 2048 }
  0x66   :  { %s110_s15 = sshll.u32 %s1482_s28, 4  ;;  %p1421_p6 = scmp.ne.s32.totalorder %s1724_s11, %s1420_s26  ;;  %s111_s15 = int_to_ptr.vmem [resolvable:$true] %s110_s15 }
  0x67   :  { %p1424_p7 = scmp.lt.u32.totalorder %s1420_s26, %s1724_s11 }
  0x69   :  { %p1426_p8 = pnand %p1424_p7, %p1421_p6 }
  0x6b   :  { %1429 = shalt.err (!%p1426_p8)
}
  0x6c   :  { %s1430_s23 = scalar_lea.vmem %s111_s15, 2048  ;;  %p1435_p10 = scmp.lt.s32.totalorder %s111_s15, %s111_s15 }
  0x6d   :  { %p1431_p9 = scmp.ne.s32.totalorder %s111_s15, %s1430_s23  ;;  %p1436_p11 = scmp.lt.s32.totalorder %s1430_s23, %s1430_s23 }
  0x6f   :  { %p1437_p12 = por %p1436_p11, %p1435_p10 }
  0x71   :  { %p1438_p13 = pnand %p1437_p12, %p1431_p9 }
  0x73   :  { %1441 = shalt.err (!%p1438_p13)
}
  0x74   :  { %116 = dma.hbm_to_vmem [thread:$0]  %s1724_s11, 2048, %s111_s15, [#allocation12], %s1476_s20, %s1476_s20, %s1477_s21  }
  0x75   :  { %1464 = dma.done.wait [#allocation3], 256  }
  0x76   :  { %1465 = vsyncadd [#allocation3], 4294967040 }
  0x77   :  { %1466 = dma.done.wait [#allocation6], 4096  }
  0x78   :  { %1467 = vsyncadd [#allocation6], 4294963200 }
  0x79   :  { %1468 = dma.done.wait [#allocation9], 4096  }
  0x7a   :  { %1469 = vsyncadd [#allocation9], 4294963200 }
  0x7b   :  { %1470 = dma.done.wait [#allocation12], 4096  }
  0x7c   :  { %1471 = vsyncadd [#allocation12], 4294963200  ;;  %v142_v0 = vld [vmem:[#allocation5] sm:$0xff]  ;;  %v143_v1 = vld [vmem:[#allocation5 + $0x8] sm:$0xff]  ;;  %s1483_s3 = smov [#allocation14]  }
  0x7d   :  { %v144_v2 = vld [vmem:[#allocation5 + $0x10] sm:$0xff]  ;;  %v1086_v3 = vpack.c.bf16 %v143_v1, %v142_v0  ;;  %v145_v4 = vld [vmem:[#allocation5 + $0x18] sm:$0xff]  ;;  %v146_v6 = vld [vmem:[#allocation5 + $0x20] sm:$0xff]  ;;  %s747_s29 = sshll.u32 %s1483_s3, 4  ;;  %s748_s29 = int_to_ptr.vmem [resolvable:$true] %s747_s29 }
  0x7e   :  { %v1090_v5 = vpack.c.bf16 %v145_v4, %v144_v2  ;;  %v147_v7 = vld [vmem:[#allocation5 + $0x28] sm:$0xff]  ;;  %v148_v9 = vld [vmem:[#allocation5 + $0x30] sm:$0xff]  ;;  %v149_v10 = vld [vmem:[#allocation5 + $0x38] sm:$0xff]  ;;  %p1447_p1 = scmp.lt.s32.totalorder %s748_s29, %s748_s29 }
  0x7f   :  { %1087 = vmatprep.subr.bf16.mxu0 %v1086_v3  ;;  %v1094_v8 = vpack.c.bf16 %v147_v7, %v146_v6  ;;  %v140_v11 = vld [vmem:[#allocation2] sm:$0xff]  ;;  %v242_v12 = vld [vmem:[#allocation7] sm:$0xff]  ;;  %v243_v13 = vld [vmem:[#allocation7 + $0x8] sm:$0xff]  ;;  %v1098_v20 = vpack.c.bf16 %v149_v10, %v148_v9 }
  0x80   :  { %1089 = vmatpush3.bf16.msra.mxu0 %v1086_v3  ;;  %908 = vmatprep.mubr.f32.mxu0 %v140_v11  ;;  %v244_v14 = vld [vmem:[#allocation7 + $0x10] sm:$0xff]  ;;  %v1118_v15 = vpack.c.bf16 %v243_v13, %v242_v12  ;;  %v245_v16 = vld [vmem:[#allocation7 + $0x18] sm:$0xff]  ;;  %v246_v18 = vld [vmem:[#allocation7 + $0x20] sm:$0xff] }
  0x81   :  { %1091 = vmatprep.subr.bf16.mxu0 %v1090_v5  ;;  %v1122_v17 = vpack.c.bf16 %v245_v16, %v244_v14  ;;  %v247_v19 = vld [vmem:[#allocation7 + $0x28] sm:$0xff]  ;;  %v150_v21 = vld [vmem:[#allocation5 + $0x40] sm:$0xff]  ;;  %v248_v24 = vld [vmem:[#allocation7 + $0x30] sm:$0xff] }
  0x82   :  { %1119 = vmatprep.subr.bf16.mxu1 %v1118_v15  ;;  %v151_v22 = vld [vmem:[#allocation5 + $0x48] sm:$0xff]  ;;  %v1126_v23 = vpack.c.bf16 %v247_v19, %v246_v18  ;;  %v249_v25 = vld [vmem:[#allocation7 + $0x38] sm:$0xff]  ;;  %v152_v27 = vld [vmem:[#allocation5 + $0x50] sm:$0xff] }
  0x83   :  { %1121 = vmatpush3.bf16.msra.mxu1 %v1118_v15  ;;  %v1102_v26 = vpack.c.bf16 %v151_v22, %v150_v21  ;;  %v153_v28 = vld [vmem:[#allocation5 + $0x58] sm:$0xff]  ;;  %v1130_v29 = vpack.c.bf16 %v249_v25, %v248_v24  ;;  %v250_v30 = vld [vmem:[#allocation7 + $0x40] sm:$0xff]  ;;  %v251_v31 = vld [vmem:[#allocation7 + $0x48] sm:$0xff] }
  0x84   :  { %1093 = vmatpush3.bf16.msra.mxu0 %v1090_v5  ;;  %1123 = vmatprep.subr.bf16.mxu1 %v1122_v17  ;;  %v1106_v32 = vpack.c.bf16 %v153_v28, %v152_v27  ;;  %v154_v33 = vld [vmem:[#allocation5 + $0x60] sm:$0xff]  ;;  %v155_v34 = vld [vmem:[#allocation5 + $0x68] sm:$0xff]  ;;  %v1134_v35 = vpack.c.bf16 %v251_v31, %v250_v30  ;;  %v252_v36 = vld [vmem:[#allocation7 + $0x50] sm:$0xff] }
  0x85   :  { %1095 = vmatprep.subr.bf16.mxu0 %v1094_v8  ;;  %v253_v37 = vld [vmem:[#allocation7 + $0x58] sm:$0xff]  ;;  %v1110_v38 = vpack.c.bf16 %v155_v34, %v154_v33  ;;  %v156_v39 = vld [vmem:[#allocation5 + $0x70] sm:$0xff]  ;;  %v254_v42 = vld [vmem:[#allocation7 + $0x60] sm:$0xff] }
  0x86   :  { %v157_v40 = vld [vmem:[#allocation5 + $0x78] sm:$0xff]  ;;  %v1138_v41 = vpack.c.bf16 %v253_v37, %v252_v36  ;;  %v255_v43 = vld [vmem:[#allocation7 + $0x68] sm:$0xff]  ;;  %v256_v47 = vld [vmem:[#allocation7 + $0x70] sm:$0xff] }
  0x87   :  { %1125 = vmatpush3.bf16.msra.mxu1 %v1122_v17  ;;  %v1114_v44 = vpack.c.bf16 %v157_v40, %v156_v39  ;;  %v1142_v45 = vpack.c.bf16 %v255_v43, %v254_v42  ;;  %v141_v46 = vld [vmem:[#allocation2 + $0x8] sm:$0xff]  ;;  %v342_v50 = vld [vmem:[#allocation8] sm:$0xff]  ;;  %v343_v51 = vld [vmem:[#allocation8 + $0x8] sm:$0xff] }
  0x88   :  { %1097 = vmatpush3.bf16.msra.mxu0 %v1094_v8  ;;  %1127 = vmatprep.subr.bf16.mxu1 %v1126_v23  ;;  %v257_v48 = vld [vmem:[#allocation7 + $0x78] sm:$0xff]  ;;  %v344_v52 = vld [vmem:[#allocation8 + $0x10] sm:$0xff]  ;;  %v1150_v53 = vpack.c.bf16 %v343_v51, %v342_v50  ;;  %v346_v56 = vld [vmem:[#allocation8 + $0x20] sm:$0xff] }
  0x89   :  { %1099 = vmatprep.subr.bf16.mxu0 %v1098_v20  ;;  %v1146_v49 = vpack.c.bf16 %v257_v48, %v256_v47  ;;  %v345_v54 = vld [vmem:[#allocation8 + $0x18] sm:$0xff]  ;;  %v347_v57 = vld [vmem:[#allocation8 + $0x28] sm:$0xff]  ;;  %v348_v59 = vld [vmem:[#allocation8 + $0x30] sm:$0xff] }
  0x8a   :  { %v1154_v55 = vpack.c.bf16 %v345_v54, %v344_v52  ;;  %v1158_v58 = vpack.c.bf16 %v347_v57, %v346_v56  ;;  %v349_v60 = vld [vmem:[#allocation8 + $0x38] sm:$0xff]  ;;  %v350_v62 = vld [vmem:[#allocation8 + $0x40] sm:$0xff]  ;;  %v351_v63 = vld [vmem:[#allocation8 + $0x48] sm:$0xff] }
  0x8b   :  { %1129 = vmatpush3.bf16.msra.mxu1 %v1126_v23  ;;  %v1162_v61 = vpack.c.bf16 %v349_v60, %v348_v59  ;;  %v1166_v0 = vpack.c.bf16 %v351_v63, %v350_v62  ;;  %v352_v1 = vld [vmem:[#allocation8 + $0x50] sm:$0xff]  ;;  %v353_v2 = vld [vmem:[#allocation8 + $0x58] sm:$0xff]  ;;  %v354_v4 = vld [vmem:[#allocation8 + $0x60] sm:$0xff] }
  0x8c   :  { %1101 = vmatpush3.bf16.msra.mxu0 %v1098_v20  ;;  %1131 = vmatprep.subr.bf16.mxu1 %v1130_v29  ;;  %v1170_v3 = vpack.c.bf16 %v353_v2, %v352_v1  ;;  %v355_v5 = vld [vmem:[#allocation8 + $0x68] sm:$0xff]  ;;  %v762_v7 = vld [vmem:[%s1715_s2] ss:$0 sm:$0xff]  ;;  %v357_v15 = vld [vmem:[#allocation8 + $0x78] sm:$0xff] }
  0x8d   :  { %1103 = vmatprep.subr.bf16.mxu0 %v1102_v26  ;;  %v1174_v6 = vpack.c.bf16 %v355_v5, %v354_v4  ;;  %v356_v14 = vld [vmem:[#allocation8 + $0x70] sm:$0xff]  ;;  %v442_v17 = vld [vmem:[#allocation10] sm:$0xff]  ;;  %v443_v18 = vld [vmem:[#allocation10 + $0x8] sm:$0xff] }
  0x8e   :  { %v1178_v16 = vpack.c.bf16 %v357_v15, %v356_v14  ;;  %v444_v19 = vld [vmem:[#allocation10 + $0x10] sm:$0xff]  ;;  %v1182_v20 = vpack.c.bf16 %v443_v18, %v442_v17  ;;  %v445_v21 = vld [vmem:[#allocation10 + $0x18] sm:$0xff]  ;;  %v446_v23 = vld [vmem:[#allocation10 + $0x20] sm:$0xff] }
  0x8f   :  { %1133 = vmatpush3.bf16.msra.mxu1 %v1130_v29  ;;  %v1186_v22 = vpack.c.bf16 %v445_v21, %v444_v19  ;;  %v447_v24 = vld [vmem:[#allocation10 + $0x28] sm:$0xff]  ;;  %v449_v27 = vld [vmem:[#allocation10 + $0x38] sm:$0xff]  ;;  %v450_v29 = vld [vmem:[#allocation10 + $0x40] sm:$0xff] }
  0x90   :  { %1105 = vmatpush3.bf16.msra.mxu0 %v1102_v26  ;;  %1135 = vmatprep.subr.bf16.mxu1 %v1134_v35  ;;  %v1190_v25 = vpack.c.bf16 %v447_v24, %v446_v23  ;;  %v448_v26 = vld [vmem:[#allocation10 + $0x30] sm:$0xff]  ;;  %v451_v30 = vld [vmem:[#allocation10 + $0x48] sm:$0xff]  ;;  %v453_v33 = vld [vmem:[#allocation10 + $0x58] sm:$0xff] }
  0x91   :  { %1107 = vmatprep.subr.bf16.mxu0 %v1106_v32  ;;  %v1194_v28 = vpack.c.bf16 %v449_v27, %v448_v26  ;;  %v1198_v31 = vpack.c.bf16 %v451_v30, %v450_v29  ;;  %v455_v36 = vld [vmem:[#allocation10 + $0x68] sm:$0xff]  ;;  %v542_v48 = vld [vmem:[#allocation11] sm:$0xff]  ;;  %v544_v50 = vld [vmem:[#allocation11 + $0x10] sm:$0xff] }
  0x92   :  { %v545_v52 = vld [vmem:[#allocation11 + $0x18] sm:$0xff]  ;;  %v546_v54 = vld [vmem:[#allocation11 + $0x20] sm:$0xff]  ;;  %v548_v57 = vld [vmem:[#allocation11 + $0x30] sm:$0xff] }
  0x93   :  { %1137 = vmatpush3.bf16.msra.mxu1 %v1134_v35  ;;  %v454_v35 = vld [vmem:[#allocation10 + $0x60] sm:$0xff]  ;;  %v552_v63 = vld [vmem:[#allocation11 + $0x50] sm:$0xff]  ;;  %v645_v19 = vld [vmem:[#allocation13 + $0x18] sm:$0xff] }
  0x94   :  { %1109 = vmatpush3.bf16.msra.mxu0 %v1106_v32  ;;  %1139 = vmatprep.subr.bf16.mxu1 %v1138_v41  ;;  %v452_v32 = vld [vmem:[#allocation10 + $0x50] sm:$0xff]  ;;  %v1206_v37 = vpack.c.bf16 %v455_v36, %v454_v35  ;;  %v550_v60 = vld [vmem:[#allocation11 + $0x40] sm:$0xff] }
  0x95   :  { %1111 = vmatprep.subr.bf16.mxu0 %v1110_v38  ;;  %v1202_v34 = vpack.c.bf16 %v453_v33, %v452_v32  ;;  %v554_v2 = vld [vmem:[#allocation11 + $0x60] sm:$0xff]  ;;  %v764_v5 = vld [vmem:[%s1719_s6] ss:$0 sm:$0xff] }
  0x96   :  { %v642_v15 = vld [vmem:[#allocation13] sm:$0xff]  ;;  %v644_v17 = vld [vmem:[#allocation13 + $0x10] sm:$0xff] }
  0x97   :  { %1141 = vmatpush3.bf16.msra.mxu1 %v1138_v41  ;;  %v646_v21 = vld [vmem:[#allocation13 + $0x20] sm:$0xff]  ;;  %v648_v24 = vld [vmem:[#allocation13 + $0x30] sm:$0xff] }
  0x98   :  { %1113 = vmatpush3.bf16.msra.mxu0 %v1110_v38  ;;  %1143 = vmatprep.subr.bf16.mxu1 %v1142_v45  ;;  %v763_v38 = vld [vmem:[%s1717_s4] ss:$0 sm:$0xff]  ;;  %v650_v27 = vld [vmem:[#allocation13 + $0x40] sm:$0xff] }
  0x99   :  { %1115 = vmatprep.subr.bf16.mxu0 %v1114_v44  ;;  %v652_v30 = vld [vmem:[#allocation13 + $0x50] sm:$0xff]  ;;  %v654_v33 = vld [vmem:[#allocation13 + $0x60] sm:$0xff] }
  0x9a   :  { %v765_v36 = vld [vmem:[%s1721_s8] ss:$0 sm:$0xff] }
  0x9b   :  { %1145 = vmatpush3.bf16.msra.mxu1 %v1142_v45  ;;  %v456_v45 = vld [vmem:[#allocation10 + $0x70] sm:$0xff] }
  0x9c   :  { %1117 = vmatpush3.bf16.msra.mxu0 %v1114_v44  ;;  %1147 = vmatprep.subr.bf16.mxu1 %v1146_v49 }
  0x9d   :  { %1151 = vmatprep.subr.bf16.mxu0 %v1150_v53 }
  0x9f   :  { %909 = vmatmul.mubr.f32.vlgmr.msra.gmra.mrb[0].mxu0 %v141_v46  ;;  %1149 = vmatpush3.bf16.msra.mxu1 %v1146_v49  ;;  %v457_v46 = vld [vmem:[#allocation10 + $0x78] sm:$0xff]  ;;  %v543_v49 = vld [vmem:[#allocation11 + $0x8] sm:$0xff] }
  0xa0   :  { %1153 = vmatpush3.bf16.msra.mxu0 %v1150_v53  ;;  %1183 = vmatprep.subr.bf16.mxu1 %v1182_v20  ;;  %v1210_v47 = vpack.c.bf16 %v457_v46, %v456_v45  ;;  %v1214_v51 = vpack.c.bf16 %v543_v49, %v542_v48  ;;  %v1218_v53 = vpack.c.bf16 %v545_v52, %v544_v50  ;;  %v766_v46 = vld [vmem:[%s1723_s10] ss:$0 sm:$0xff]  ;;  %s1442_s10 = scalar_lea.vmem %s748_s29, 256 }
  0xa1   :  { %1155 = vmatprep.subr.bf16.mxu0 %v1154_v55  ;;  %p1443_p0 = scmp.ne.s32.totalorder %s748_s29, %s1442_s10  ;;  %p1448_p2 = scmp.lt.s32.totalorder %s1442_s10, %s1442_s10 }
  0xa3   :  { %p1449_p3 = por %p1448_p2, %p1447_p1 }
  0xa4   :  { %1157 = vmatpush3.bf16.msra.mxu0 %v1154_v55  ;;  %v547_v55 = vld [vmem:[#allocation11 + $0x28] sm:$0xff] }
  0xa5   :  { %1159 = vmatprep.subr.bf16.mxu0 %v1158_v58  ;;  %v1222_v56 = vpack.c.bf16 %v547_v55, %v546_v54  ;;  %p1450_p4 = pnand %p1449_p3, %p1443_p0 }
  0xa8   :  { %1161 = vmatpush3.bf16.msra.mxu0 %v1158_v58  ;;  %v549_v58 = vld [vmem:[#allocation11 + $0x38] sm:$0xff] }
  0xa9   :  { %1163 = vmatprep.subr.bf16.mxu0 %v1162_v61  ;;  %v1226_v59 = vpack.c.bf16 %v549_v58, %v548_v57 }
  0xac   :  { %1165 = vmatpush3.bf16.msra.mxu0 %v1162_v61  ;;  %v551_v61 = vld [vmem:[#allocation11 + $0x48] sm:$0xff] }
  0xad   :  { %1167 = vmatprep.subr.bf16.mxu0 %v1166_v0  ;;  %v1230_v62 = vpack.c.bf16 %v551_v61, %v550_v60 }
  0xb0   :  { %1169 = vmatpush3.bf16.msra.mxu0 %v1166_v0  ;;  %v553_v0 = vld [vmem:[#allocation11 + $0x58] sm:$0xff] }
  0xb1   :  { %1171 = vmatprep.subr.bf16.mxu0 %v1170_v3  ;;  %v1234_v1 = vpack.c.bf16 %v553_v0, %v552_v63 }
  0xb4   :  { %1173 = vmatpush3.bf16.msra.mxu0 %v1170_v3  ;;  %v555_v3 = vld [vmem:[#allocation11 + $0x68] sm:$0xff] }
  0xb5   :  { %1175 = vmatprep.subr.bf16.mxu0 %v1174_v6  ;;  %v1238_v4 = vpack.c.bf16 %v555_v3, %v554_v2 }
  0xb8   :  { %1177 = vmatpush3.bf16.msra.mxu0 %v1174_v6 }
  0xb9   :  { %1179 = vmatprep.subr.bf16.mxu0 %v1178_v16 }
  0xbc   :  { %1181 = vmatpush3.bf16.msra.mxu0 %v1178_v16  ;;  %v643_v16 = vld [vmem:[#allocation13 + $0x8] sm:$0xff] }
  0xbd   :  { %1215 = vmatprep.subr.bf16.mxu0 %v1214_v51  ;;  %v1246_v18 = vpack.c.bf16 %v643_v16, %v642_v15 }
 0x172   :  { %v910_v8 = vpop.f32.mrb[0].mxu0 }
 0x173   :  { %v237_v9 = vadd.f32 %v910_v8, %v762_v7  ;;  %v231_v10 = vpop.f32.mrb[1].mxu0 }
 0x174   :  { %v232_v11 = vadd.f32 %v762_v7, %v231_v10 }
 0x175   :  { %v241_v13 = vmax.f32 %v237_v9, 0.0 }
 0x176   :  { %v240_v12 = vmax.f32 %v232_v11, 0.0 }
 0x178   :  { %943 = vmatprep.mubr.f32.mxu1 %v240_v12  ;;  %v556_v12 = vld [vmem:[#allocation11 + $0x70] sm:$0xff] }
 0x179   :  { %944 = vmatmul.mubr.f32.vlgmr.msra.gmra.mrb[0].mxu1 %v241_v13  ;;  %v557_v13 = vld [vmem:[#allocation11 + $0x78] sm:$0xff] }
 0x17a   :  { %1185 = vmatpush3.bf16.msra.mxu1 %v1182_v20  ;;  %v1242_v14 = vpack.c.bf16 %v557_v13, %v556_v12  ;;  %v1250_v20 = vpack.c.bf16 %v645_v19, %v644_v17 }
 0x17b   :  { %1187 = vmatprep.subr.bf16.mxu1 %v1186_v22 }
 0x17e   :  { %1189 = vmatpush3.bf16.msra.mxu1 %v1186_v22  ;;  %v647_v22 = vld [vmem:[#allocation13 + $0x28] sm:$0xff] }
 0x17f   :  { %1191 = vmatprep.subr.bf16.mxu1 %v1190_v25  ;;  %v1254_v23 = vpack.c.bf16 %v647_v22, %v646_v21 }
 0x182   :  { %1193 = vmatpush3.bf16.msra.mxu1 %v1190_v25  ;;  %v649_v25 = vld [vmem:[#allocation13 + $0x38] sm:$0xff] }
 0x183   :  { %1195 = vmatprep.subr.bf16.mxu1 %v1194_v28  ;;  %v1258_v26 = vpack.c.bf16 %v649_v25, %v648_v24 }
 0x186   :  { %1197 = vmatpush3.bf16.msra.mxu1 %v1194_v28  ;;  %v651_v28 = vld [vmem:[#allocation13 + $0x48] sm:$0xff] }
 0x187   :  { %1199 = vmatprep.subr.bf16.mxu1 %v1198_v31  ;;  %v1262_v29 = vpack.c.bf16 %v651_v28, %v650_v27 }
 0x18a   :  { %1201 = vmatpush3.bf16.msra.mxu1 %v1198_v31  ;;  %v653_v31 = vld [vmem:[#allocation13 + $0x58] sm:$0xff] }
 0x18b   :  { %1203 = vmatprep.subr.bf16.mxu1 %v1202_v34  ;;  %v1266_v32 = vpack.c.bf16 %v653_v31, %v652_v30 }
 0x18e   :  { %1205 = vmatpush3.bf16.msra.mxu1 %v1202_v34  ;;  %v655_v34 = vld [vmem:[#allocation13 + $0x68] sm:$0xff] }
 0x18f   :  { %1207 = vmatprep.subr.bf16.mxu1 %v1206_v37  ;;  %v1270_v35 = vpack.c.bf16 %v655_v34, %v654_v33 }
 0x192   :  { %1209 = vmatpush3.bf16.msra.mxu1 %v1206_v37 }
 0x193   :  { %1211 = vmatprep.subr.bf16.mxu1 %v1210_v47 }
 0x196   :  { %1213 = vmatpush3.bf16.msra.mxu1 %v1210_v47 }
 0x197   :  { %1247 = vmatprep.subr.bf16.mxu1 %v1246_v18 }
 0x24c   :  { %v945_v39 = vpop.f32.mrb[0].mxu1 }
 0x24d   :  { %v337_v40 = vadd.f32 %v945_v39, %v763_v38  ;;  %v331_v41 = vpop.f32.mrb[1].mxu1 }
 0x24e   :  { %v332_v42 = vadd.f32 %v763_v38, %v331_v41 }
 0x24f   :  { %v341_v44 = vmax.f32 %v337_v40, 0.0 }
 0x250   :  { %v340_v43 = vmax.f32 %v332_v42, 0.0 }
 0x252   :  { %978 = vmatprep.mubr.f32.mxu0 %v340_v43  ;;  %v656_v43 = vld [vmem:[#allocation13 + $0x70] sm:$0xff] }
 0x253   :  { %979 = vmatmul.mubr.f32.vlgmr.msra.gmra.mrb[2].mxu0 %v341_v44  ;;  %v657_v44 = vld [vmem:[#allocation13 + $0x78] sm:$0xff] }
 0x254   :  { %1217 = vmatpush3.bf16.msra.mxu0 %v1214_v51  ;;  %v1274_v45 = vpack.c.bf16 %v657_v44, %v656_v43 }
 0x255   :  { %1219 = vmatprep.subr.bf16.mxu0 %v1218_v53 }
 0x258   :  { %1221 = vmatpush3.bf16.msra.mxu0 %v1218_v53  ;;  %v767_v53 = vld [vmem:[%s1725_s12] ss:$0 sm:$0xff] }
 0x259   :  { %1223 = vmatprep.subr.bf16.mxu0 %v1222_v56 }
 0x25c   :  { %1225 = vmatpush3.bf16.msra.mxu0 %v1222_v56 }
 0x25d   :  { %1227 = vmatprep.subr.bf16.mxu0 %v1226_v59 }
 0x260   :  { %1229 = vmatpush3.bf16.msra.mxu0 %v1226_v59 }
 0x261   :  { %1231 = vmatprep.subr.bf16.mxu0 %v1230_v62 }
 0x264   :  { %1233 = vmatpush3.bf16.msra.mxu0 %v1230_v62 }
 0x265   :  { %1235 = vmatprep.subr.bf16.mxu0 %v1234_v1 }
 0x268   :  { %1237 = vmatpush3.bf16.msra.mxu0 %v1234_v1 }
 0x269   :  { %1239 = vmatprep.subr.bf16.mxu0 %v1238_v4 }
 0x26c   :  { %1241 = vmatpush3.bf16.msra.mxu0 %v1238_v4 }
 0x26d   :  { %1243 = vmatprep.subr.bf16.mxu0 %v1242_v14 }
 0x270   :  { %1245 = vmatpush3.bf16.msra.mxu0 %v1242_v14 }
 0x326   :  { %v980_v6 = vpop.f32.mrb[2].mxu0 }
 0x327   :  { %v437_v7 = vadd.f32 %v980_v6, %v764_v5  ;;  %v431_v8 = vpop.f32.mrb[3].mxu0 }
 0x328   :  { %v432_v9 = vadd.f32 %v764_v5, %v431_v8 }
 0x329   :  { %v441_v11 = vmax.f32 %v437_v7, 0.0 }
 0x32a   :  { %v440_v10 = vmax.f32 %v432_v9, 0.0 }
 0x32c   :  { %1013 = vmatprep.mubr.f32.mxu1 %v440_v10 }
 0x32d   :  { %1014 = vmatmul.mubr.f32.vlgmr.msra.gmra.mrb[2].mxu1 %v441_v11 }
 0x32e   :  { %1249 = vmatpush3.bf16.msra.mxu1 %v1246_v18 }
 0x32f   :  { %1251 = vmatprep.subr.bf16.mxu1 %v1250_v20 }
 0x332   :  { %1253 = vmatpush3.bf16.msra.mxu1 %v1250_v20 }
 0x333   :  { %1255 = vmatprep.subr.bf16.mxu1 %v1254_v23 }
 0x336   :  { %1257 = vmatpush3.bf16.msra.mxu1 %v1254_v23 }
 0x337   :  { %1259 = vmatprep.subr.bf16.mxu1 %v1258_v26 }
 0x33a   :  { %1261 = vmatpush3.bf16.msra.mxu1 %v1258_v26 }
 0x33b   :  { %1263 = vmatprep.subr.bf16.mxu1 %v1262_v29 }
 0x33e   :  { %1265 = vmatpush3.bf16.msra.mxu1 %v1262_v29 }
 0x33f   :  { %1267 = vmatprep.subr.bf16.mxu1 %v1266_v32 }
 0x342   :  { %1269 = vmatpush3.bf16.msra.mxu1 %v1266_v32 }
 0x343   :  { %1271 = vmatprep.subr.bf16.mxu1 %v1270_v35 }
 0x346   :  { %1273 = vmatpush3.bf16.msra.mxu1 %v1270_v35 }
 0x347   :  { %1275 = vmatprep.subr.bf16.mxu1 %v1274_v45 }
 0x34a   :  { %1277 = vmatpush3.bf16.msra.mxu1 %v1274_v45 }
 0x400   :  { %v1015_v37 = vpop.f32.mrb[2].mxu1 }
 0x401   :  { %v537_v38 = vadd.f32 %v1015_v37, %v765_v36  ;;  %v531_v39 = vpop.f32.mrb[3].mxu1 }
 0x402   :  { %v532_v40 = vadd.f32 %v765_v36, %v531_v39 }
 0x403   :  { %v541_v42 = vmax.f32 %v537_v38, 0.0 }
 0x404   :  { %v540_v41 = vmax.f32 %v532_v40, 0.0 }
 0x406   :  { %1048 = vmatprep.mubr.f32.mxu0 %v540_v41 }
 0x407   :  { %1049 = vmatmul.mubr.f32.vlgmr.msra.gmra.mrb[4].mxu0 %v541_v42 }
 0x4da   :  { %v1050_v47 = vpop.f32.mrb[4].mxu0 }
 0x4db   :  { %v637_v48 = vadd.f32 %v1050_v47, %v766_v46  ;;  %v631_v49 = vpop.f32.mrb[5].mxu0 }
 0x4dc   :  { %v632_v50 = vadd.f32 %v766_v46, %v631_v49 }
 0x4dd   :  { %v641_v52 = vmax.f32 %v637_v48, 0.0 }
 0x4de   :  { %v640_v51 = vmax.f32 %v632_v50, 0.0 }
 0x4e0   :  { %1083 = vmatprep.mubr.f32.mxu1 %v640_v51 }
 0x4e1   :  { %1084 = vmatmul.mubr.f32.vlgmr.msra.gmra.mrb[4].mxu1 %v641_v52 }
 0x5b4   :  { %v1085_v54 = vpop.f32.mrb[4].mxu1 }
 0x5b5   :  { %v737_v55 = vadd.f32 %v1085_v54, %v767_v53  ;;  %v731_v56 = vpop.f32.mrb[5].mxu1 }
 0x5b6   :  { %v732_v57 = vadd.f32 %v767_v53, %v731_v56 }
 0x5b7   :  { %741 = vst [vmem:[#allocation14 + $0x8] sm:$0xff] %v737_v55 }
 0x5b8   :  { %740 = vst [vmem:[#allocation14] sm:$0xff] %v732_v57 }
 0x5b9   :  { %1453 = shalt.err (!%p1450_p4)
}
 0x5ba   :  { %s1454_s12 = scalar_lea.hbm %s1726_s13, 256 }
 0x5bb   :  { %p1455_p5 = scmp.ne.s32.totalorder %s1726_s13, %s1454_s12  ;;  %p1458_p6 = scmp.lt.u32.totalorder %s1454_s12, %s1726_s13 }
 0x5bd   :  { %p1460_p7 = pnand %p1458_p6, %p1455_p5 }
 0x5bf   :  { %1463 = shalt.err (!%p1460_p7)
}
 0x5c0   :  { %753 = dma.vmem_to_hbm [thread:$0]  %s748_s29, 256, %s1726_s13, [#allocation4], %s1476_s20, %s1476_s20, %s1477_s21  }
 0x5c1   :  { %1472 = dma.done.wait [#allocation4], 256  }
 0x5c2   :  { %1473 = vsyncadd [#allocation4], 4294967040 }
 0x5c3   :  { %757 = vsyncpa [#allocation3], 1 }
 0x5c4   :  { %758 = vsyncpa [#allocation6], 1 }
 0x5c5   :  { %759 = vsyncpa [#allocation9], 1 }
 0x5c6   :  { %760 = vsyncpa [#allocation12], 1 }
 0x5c7   :  { %761 = vsyncpa [#allocation4], 1 }

// kernel: tpu_custom_call.1
= control target key start
LH: loop header
LB: loop body
LE: loop exit
PB: predicated region body
PF: predicated region fallthrough
CT: control target
= control target key end

     0   :  { %18 = vsyncpa [#allocation3], 0  ;;  %s1713_s0 = inlined_call_operand.hbm [shape: f32[16,128], index: 0, kind: input, shape index: {}]   ;;  %s1714_s1 = inlined_call_operand.hbm [shape: f32[128,128], index: 1, kind: input, shape index: {}]   ;;  %s1715_s2 = inlined_call_operand.vmem [shape: f32[1,128], index: 2, kind: input, shape index: {}]   ;;  %s1716_s3 = inlined_call_operand.hbm [shape: f32[128,128], index: 3, kind: input, shape index: {}]   ;;  %s1717_s4 = inlined_call_operand.vmem [shape: f32[1,128], index: 4, kind: input, shape index: {}]   ;;  %s1718_s5 = inlined_call_operand.hbm [shape: f32[128,128], index: 5, kind: input, shape index: {}]   ;;  %s1719_s6 = inlined_call_operand.vmem [shape: f32[1,128], index: 6, kind: input, shape index: {}]   ;;  %s1720_s7 = inlined_call_operand.hbm [shape: f32[128,128], index: 7, kind: input, shape index: {}]   ;;  %s1721_s8 = inlined_call_operand.vmem [shape: f32[1,128], index: 8, kind: input, shape index: {}]   ;;  %s1722_s9 = inlined_call_operand.hbm [shape: f32[128,128], index: 9, kind: input, shape index: {}]   ;;  %s1723_s10 = inlined_call_operand.vmem [shape: f32[1,128], index: 10, kind: input, shape index: {}]   ;;  %s1724_s11 = inlined_call_operand.hbm [shape: f32[128,128], index: 11, kind: input, shape index: {}]   ;;  %s1725_s12 = inlined_call_operand.vmem [shape: f32[1,128], index: 12, kind: input, shape index: {}]   ;;  %s1726_s13 = inlined_call_operand.hbm [shape: f32[16,128], index: 13, kind: output, shape index: {}]  }
   0x1   :  { %19 = vsyncpa [#allocation6], 0 }
   0x2   :  { %20 = vsyncpa [#allocation9], 0 }
   0x3   :  { %21 = vsyncpa [#allocation12], 0 }
   0x4   :  { %22 = vsyncpa [#allocation4], 0  ;;  %s1474_s25 = smov [#allocation5]   ;;  %s1475_s27 = smov [#allocation8]  }
   0x5   :  { %s40_s26 = sshll.u32 %s1474_s25, 4  ;;  %s68_s28 = sshll.u32 %s1475_s27, 4  ;;  %s41_s26 = int_to_ptr.vmem [resolvable:$true] %s40_s26  ;;  %s1554_s28 = int_to_ptr.vmem [resolvable:$true] %s68_s28 }
   0x6   :  { %s1288_s14 = scalar_lea.hbm %s1714_s1, 2048 }
   0x7   :  { %p1289_p0 = scmp.ne.s32.totalorder %s1714_s1, %s1288_s14  ;;  %p1292_p1 = scmp.lt.u32.totalorder %s1288_s14, %s1714_s1 }
   0x9   :  { %p1294_p2 = pnand %p1292_p1, %p1289_p0 }
   0xb   :  { %1297 = shalt.err (!%p1294_p2)
}
   0xc   :  { %s1298_s19 = scalar_lea.vmem %s41_s26, 2048  ;;  %p1303_p4 = scmp.lt.s32.totalorder %s41_s26, %s41_s26 }
   0xd   :  { %p1299_p3 = scmp.ne.s32.totalorder %s41_s26, %s1298_s19  ;;  %p1304_p5 = scmp.lt.s32.totalorder %s1298_s19, %s1298_s19 }
   0xf   :  { %p1305_p6 = por %p1304_p5, %p1303_p4 }
  0x11   :  { %p1306_p7 = pnand %p1305_p6, %p1299_p3 }
  0x13   :  { %1309 = shalt.err (!%p1306_p7)
}
  0x14   :  { %s1476_s20 = smov 128   ;;  %s1477_s21 = smov 8  }
  0x15   :  { %46 = dma.hbm_to_vmem [thread:$0]  %s1714_s1, 2048, %s41_s26, [#allocation6], %s1476_s20, %s1476_s20, %s1477_s21  }
  0x16   :  { %s1310_s27 = scalar_lea.hbm %s1718_s5, 2048 }
  0x17   :  { %p1311_p8 = scmp.ne.s32.totalorder %s1718_s5, %s1310_s27  ;;  %p1314_p9 = scmp.lt.u32.totalorder %s1310_s27, %s1718_s5 }
  0x19   :  { %p1316_p10 = pnand %p1314_p9, %p1311_p8 }
  0x1b   :  { %1319 = shalt.err (!%p1316_p10)
}
  0x1c   :  { %s1320_s16 = scalar_lea.vmem %s1554_s28, 2048  ;;  %p1325_p12 = scmp.lt.s32.totalorder %s1554_s28, %s1554_s28 }
  0x1d   :  { %p1321_p11 = scmp.ne.s32.totalorder %s1554_s28, %s1320_s16  ;;  %p1326_p13 = scmp.lt.s32.totalorder %s1320_s16, %s1320_s16 }
  0x1f   :  { %p1327_p0 = por %p1326_p13, %p1325_p12 }
  0x21   :  { %p1328_p1 = pnand %p1327_p0, %p1321_p11 }
  0x23   :  { %1331 = shalt.err (!%p1328_p1)
}
  0x24   :  { %74 = dma.hbm_to_vmem [thread:$0]  %s1718_s5, 2048, %s1554_s28, [#allocation9], %s1476_s20, %s1476_s20, %s1477_s21  }
  0x25   :  { %s1478_s17 = smov [#allocation11]   ;;  %s1479_s19 = smov [#allocation2]  }
  0x26   :  { %s96_s18 = sshll.u32 %s1478_s17, 4  ;;  %s28_s22 = sshll.u32 %s1479_s19, 4  ;;  %s97_s18 = int_to_ptr.vmem [resolvable:$true] %s96_s18  ;;  %s1591_s22 = int_to_ptr.vmem [resolvable:$true] %s28_s22 }
  0x27   :  { %s1332_s25 = scalar_lea.hbm %s1722_s9, 2048 }
  0x28   :  { %p1333_p2 = scmp.ne.s32.totalorder %s1722_s9, %s1332_s25  ;;  %p1336_p3 = scmp.lt.u32.totalorder %s1332_s25, %s1722_s9 }
  0x2a   :  { %p1338_p4 = pnand %p1336_p3, %p1333_p2 }
  0x2c   :  { %1341 = shalt.err (!%p1338_p4)
}
  0x2d   :  { %s1342_s5 = scalar_lea.vmem %s97_s18, 2048  ;;  %p1347_p6 = scmp.lt.s32.totalorder %s97_s18, %s97_s18 }
  0x2e   :  { %p1343_p5 = scmp.ne.s32.totalorder %s97_s18, %s1342_s5  ;;  %p1348_p7 = scmp.lt.s32.totalorder %s1342_s5, %s1342_s5 }
  0x30   :  { %p1349_p8 = por %p1348_p7, %p1347_p6 }
  0x32   :  { %p1350_p9 = pnand %p1349_p8, %p1343_p5 }
  0x34   :  { %1353 = shalt.err (!%p1350_p9)
}
  0x35   :  { %102 = dma.hbm_to_vmem [thread:$0]  %s1722_s9, 2048, %s97_s18, [#allocation12], %s1476_s20, %s1476_s20, %s1477_s21  }
  0x36   :  { %s1354_s26 = scalar_lea.hbm %s1713_s0, 256 }
  0x37   :  { %p1355_p10 = scmp.ne.s32.totalorder %s1713_s0, %s1354_s26  ;;  %p1358_p11 = scmp.lt.u32.totalorder %s1354_s26, %s1713_s0 }
  0x39   :  { %p1360_p12 = pnand %p1358_p11, %p1355_p10 }
  0x3b   :  { %1363 = shalt.err (!%p1360_p12)
}
  0x3c   :  { %s1364_s25 = scalar_lea.vmem %s1591_s22, 256  ;;  %p1369_p0 = scmp.lt.s32.totalorder %s1591_s22, %s1591_s22 }
  0x3d   :  { %p1365_p13 = scmp.ne.s32.totalorder %s1591_s22, %s1364_s25  ;;  %p1370_p1 = scmp.lt.s32.totalorder %s1364_s25, %s1364_s25 }
  0x3f   :  { %p1371_p2 = por %p1370_p1, %p1369_p0 }
  0x41   :  { %p1372_p3 = pnand %p1371_p2, %p1365_p13 }
  0x43   :  { %1375 = shalt.err (!%p1372_p3)
}
  0x44   :  { %34 = dma.hbm_to_vmem [thread:$0]  %s1713_s0, 256, %s1591_s22, [#allocation3], %s1476_s20, %s1476_s20, %s1477_s21  }
  0x45   :  { %s1480_s27 = smov [#allocation7]   ;;  %s1481_s30 = smov [#allocation10]  }
  0x46   :  { %s54_s29 = sshll.u32 %s1480_s27, 4  ;;  %s82_s14 = sshll.u32 %s1481_s30, 4  ;;  %s55_s29 = int_to_ptr.vmem [resolvable:$true] %s54_s29  ;;  %s1628_s14 = int_to_ptr.vmem [resolvable:$true] %s82_s14 }
  0x47   :  { %s1376_s15 = scalar_lea.hbm %s1716_s3, 2048 }
  0x48   :  { %p1377_p4 = scmp.ne.s32.totalorder %s1716_s3, %s1376_s15  ;;  %p1380_p5 = scmp.lt.u32.totalorder %s1376_s15, %s1716_s3 }
  0x4a   :  { %p1382_p6 = pnand %p1380_p5, %p1377_p4 }
  0x4c   :  { %1385 = shalt.err (!%p1382_p6)
}
  0x4d   :  { %s1386_s0 = scalar_lea.vmem %s55_s29, 2048  ;;  %p1391_p8 = scmp.lt.s32.totalorder %s55_s29, %s55_s29 }
  0x4e   :  { %p1387_p7 = scmp.ne.s32.totalorder %s55_s29, %s1386_s0  ;;  %p1392_p9 = scmp.lt.s32.totalorder %s1386_s0, %s1386_s0 }
  0x50   :  { %p1393_p10 = por %p1392_p9, %p1391_p8 }
  0x52   :  { %p1394_p11 = pnand %p1393_p10, %p1387_p7 }
  0x54   :  { %1397 = shalt.err (!%p1394_p11)
}
  0x55   :  { %60 = dma.hbm_to_vmem [thread:$0]  %s1716_s3, 2048, %s55_s29, [#allocation6], %s1476_s20, %s1476_s20, %s1477_s21  }
  0x56   :  { %s1398_s25 = scalar_lea.hbm %s1720_s7, 2048 }
  0x57   :  { %p1399_p12 = scmp.ne.s32.totalorder %s1720_s7, %s1398_s25  ;;  %p1402_p13 = scmp.lt.u32.totalorder %s1398_s25, %s1720_s7 }
  0x59   :  { %p1404_p0 = pnand %p1402_p13, %p1399_p12 }
  0x5b   :  { %1407 = shalt.err (!%p1404_p0)
}
  0x5c   :  { %s1408_s5 = scalar_lea.vmem %s1628_s14, 2048  ;;  %p1413_p2 = scmp.lt.s32.totalorder %s1628_s14, %s1628_s14 }
  0x5d   :  { %p1409_p1 = scmp.ne.s32.totalorder %s1628_s14, %s1408_s5  ;;  %p1414_p3 = scmp.lt.s32.totalorder %s1408_s5, %s1408_s5 }
  0x5f   :  { %p1415_p4 = por %p1414_p3, %p1413_p2 }
  0x61   :  { %p1416_p5 = pnand %p1415_p4, %p1409_p1 }
  0x63   :  { %1419 = shalt.err (!%p1416_p5)
}
  0x64   :  { %88 = dma.hbm_to_vmem [thread:$0]  %s1720_s7, 2048, %s1628_s14, [#allocation9], %s1476_s20, %s1476_s20, %s1477_s21  }
  0x65   :  { %s1482_s28 = smov [#allocation13]   ;;  %s1420_s26 = scalar_lea.hbm %s1724_s11, 2048 }
  0x66   :  { %s110_s15 = sshll.u32 %s1482_s28, 4  ;;  %p1421_p6 = scmp.ne.s32.totalorder %s1724_s11, %s1420_s26  ;;  %s111_s15 = int_to_ptr.vmem [resolvable:$true] %s110_s15 }
  0x67   :  { %p1424_p7 = scmp.lt.u32.totalorder %s1420_s26, %s1724_s11 }
  0x69   :  { %p1426_p8 = pnand %p1424_p7, %p1421_p6 }
  0x6b   :  { %1429 = shalt.err (!%p1426_p8)
}
  0x6c   :  { %s1430_s23 = scalar_lea.vmem %s111_s15, 2048  ;;  %p1435_p10 = scmp.lt.s32.totalorder %s111_s15, %s111_s15 }
  0x6d   :  { %p1431_p9 = scmp.ne.s32.totalorder %s111_s15, %s1430_s23  ;;  %p1436_p11 = scmp.lt.s32.totalorder %s1430_s23, %s1430_s23 }
  0x6f   :  { %p1437_p12 = por %p1436_p11, %p1435_p10 }
  0x71   :  { %p1438_p13 = pnand %p1437_p12, %p1431_p9 }
  0x73   :  { %1441 = shalt.err (!%p1438_p13)
}
  0x74   :  { %116 = dma.hbm_to_vmem [thread:$0]  %s1724_s11, 2048, %s111_s15, [#allocation12], %s1476_s20, %s1476_s20, %s1477_s21  }
  0x75   :  { %1464 = dma.done.wait [#allocation3], 256  }
  0x76   :  { %1465 = vsyncadd [#allocation3], 4294967040 }
  0x77   :  { %1466 = dma.done.wait [#allocation6], 4096  }
  0x78   :  { %1467 = vsyncadd [#allocation6], 4294963200 }
  0x79   :  { %1468 = dma.done.wait [#allocation9], 4096  }
  0x7a   :  { %1469 = vsyncadd [#allocation9], 4294963200 }
  0x7b   :  { %1470 = dma.done.wait [#allocation12], 4096  }
  0x7c   :  { %1471 = vsyncadd [#allocation12], 4294963200  ;;  %v142_v0 = vld [vmem:[#allocation5] sm:$0xff]  ;;  %v143_v1 = vld [vmem:[#allocation5 + $0x8] sm:$0xff]  ;;  %s1483_s3 = smov [#allocation14]  }
  0x7d   :  { %v144_v2 = vld [vmem:[#allocation5 + $0x10] sm:$0xff]  ;;  %v1086_v3 = vpack.c.bf16 %v143_v1, %v142_v0  ;;  %v145_v4 = vld [vmem:[#allocation5 + $0x18] sm:$0xff]  ;;  %v146_v6 = vld [vmem:[#allocation5 + $0x20] sm:$0xff]  ;;  %s747_s29 = sshll.u32 %s1483_s3, 4  ;;  %s748_s29 = int_to_ptr.vmem [resolvable:$true] %s747_s29 }
  0x7e   :  { %v1090_v5 = vpack.c.bf16 %v145_v4, %v144_v2  ;;  %v147_v7 = vld [vmem:[#allocation5 + $0x28] sm:$0xff]  ;;  %v148_v9 = vld [vmem:[#allocation5 + $0x30] sm:$0xff]  ;;  %v149_v10 = vld [vmem:[#allocation5 + $0x38] sm:$0xff]  ;;  %p1447_p1 = scmp.lt.s32.totalorder %s748_s29, %s748_s29 }
  0x7f   :  { %1087 = vmatprep.subr.bf16.mxu0 %v1086_v3  ;;  %v1094_v8 = vpack.c.bf16 %v147_v7, %v146_v6  ;;  %v140_v11 = vld [vmem:[#allocation2] sm:$0xff]  ;;  %v242_v12 = vld [vmem:[#allocation7] sm:$0xff]  ;;  %v243_v13 = vld [vmem:[#allocation7 + $0x8] sm:$0xff]  ;;  %v1098_v20 = vpack.c.bf16 %v149_v10, %v148_v9 }
  0x80   :  { %1089 = vmatpush3.bf16.msra.mxu0 %v1086_v3  ;;  %908 = vmatprep.mubr.f32.mxu0 %v140_v11  ;;  %v244_v14 = vld [vmem:[#allocation7 + $0x10] sm:$0xff]  ;;  %v1118_v15 = vpack.c.bf16 %v243_v13, %v242_v12  ;;  %v245_v16 = vld [vmem:[#allocation7 + $0x18] sm:$0xff]  ;;  %v246_v18 = vld [vmem:[#allocation7 + $0x20] sm:$0xff] }
  0x81   :  { %1091 = vmatprep.subr.bf16.mxu0 %v1090_v5  ;;  %v1122_v17 = vpack.c.bf16 %v245_v16, %v244_v14  ;;  %v247_v19 = vld [vmem:[#allocation7 + $0x28] sm:$0xff]  ;;  %v150_v21 = vld [vmem:[#allocation5 + $0x40] sm:$0xff]  ;;  %v248_v24 = vld [vmem:[#allocation7 + $0x30] sm:$0xff] }
  0x82   :  { %1119 = vmatprep.subr.bf16.mxu1 %v1118_v15  ;;  %v151_v22 = vld [vmem:[#allocation5 + $0x48] sm:$0xff]  ;;  %v1126_v23 = vpack.c.bf16 %v247_v19, %v246_v18  ;;  %v249_v25 = vld [vmem:[#allocation7 + $0x38] sm:$0xff]  ;;  %v152_v27 = vld [vmem:[#allocation5 + $0x50] sm:$0xff] }
  0x83   :  { %1121 = vmatpush3.bf16.msra.mxu1 %v1118_v15  ;;  %v1102_v26 = vpack.c.bf16 %v151_v22, %v150_v21  ;;  %v153_v28 = vld [vmem:[#allocation5 + $0x58] sm:$0xff]  ;;  %v1130_v29 = vpack.c.bf16 %v249_v25, %v248_v24  ;;  %v250_v30 = vld [vmem:[#allocation7 + $0x40] sm:$0xff]  ;;  %v251_v31 = vld [vmem:[#allocation7 + $0x48] sm:$0xff] }
  0x84   :  { %1093 = vmatpush3.bf16.msra.mxu0 %v1090_v5  ;;  %1123 = vmatprep.subr.bf16.mxu1 %v1122_v17  ;;  %v1106_v32 = vpack.c.bf16 %v153_v28, %v152_v27  ;;  %v154_v33 = vld [vmem:[#allocation5 + $0x60] sm:$0xff]  ;;  %v155_v34 = vld [vmem:[#allocation5 + $0x68] sm:$0xff]  ;;  %v1134_v35 = vpack.c.bf16 %v251_v31, %v250_v30  ;;  %v252_v36 = vld [vmem:[#allocation7 + $0x50] sm:$0xff] }
  0x85   :  { %1095 = vmatprep.subr.bf16.mxu0 %v1094_v8  ;;  %v253_v37 = vld [vmem:[#allocation7 + $0x58] sm:$0xff]  ;;  %v1110_v38 = vpack.c.bf16 %v155_v34, %v154_v33  ;;  %v156_v39 = vld [vmem:[#allocation5 + $0x70] sm:$0xff]  ;;  %v254_v42 = vld [vmem:[#allocation7 + $0x60] sm:$0xff] }
  0x86   :  { %v157_v40 = vld [vmem:[#allocation5 + $0x78] sm:$0xff]  ;;  %v1138_v41 = vpack.c.bf16 %v253_v37, %v252_v36  ;;  %v255_v43 = vld [vmem:[#allocation7 + $0x68] sm:$0xff]  ;;  %v256_v47 = vld [vmem:[#allocation7 + $0x70] sm:$0xff] }
  0x87   :  { %1125 = vmatpush3.bf16.msra.mxu1 %v1122_v17  ;;  %v1114_v44 = vpack.c.bf16 %v157_v40, %v156_v39  ;;  %v1142_v45 = vpack.c.bf16 %v255_v43, %v254_v42  ;;  %v141_v46 = vld [vmem:[#allocation2 + $0x8] sm:$0xff]  ;;  %v342_v50 = vld [vmem:[#allocation8] sm:$0xff]  ;;  %v343_v51 = vld [vmem:[#allocation8 + $0x8] sm:$0xff] }
  0x88   :  { %1097 = vmatpush3.bf16.msra.mxu0 %v1094_v8  ;;  %1127 = vmatprep.subr.bf16.mxu1 %v1126_v23  ;;  %v257_v48 = vld [vmem:[#allocation7 + $0x78] sm:$0xff]  ;;  %v344_v52 = vld [vmem:[#allocation8 + $0x10] sm:$0xff]  ;;  %v1150_v53 = vpack.c.bf16 %v343_v51, %v342_v50  ;;  %v346_v56 = vld [vmem:[#allocation8 + $0x20] sm:$0xff] }
  0x89   :  { %1099 = vmatprep.subr.bf16.mxu0 %v1098_v20  ;;  %v1146_v49 = vpack.c.bf16 %v257_v48, %v256_v47  ;;  %v345_v54 = vld [vmem:[#allocation8 + $0x18] sm:$0xff]  ;;  %v347_v57 = vld [vmem:[#allocation8 + $0x28] sm:$0xff]  ;;  %v348_v59 = vld [vmem:[#allocation8 + $0x30] sm:$0xff] }
  0x8a   :  { %v1154_v55 = vpack.c.bf16 %v345_v54, %v344_v52  ;;  %v1158_v58 = vpack.c.bf16 %v347_v57, %v346_v56  ;;  %v349_v60 = vld [vmem:[#allocation8 + $0x38] sm:$0xff]  ;;  %v350_v62 = vld [vmem:[#allocation8 + $0x40] sm:$0xff]  ;;  %v351_v63 = vld [vmem:[#allocation8 + $0x48] sm:$0xff] }
  0x8b   :  { %1129 = vmatpush3.bf16.msra.mxu1 %v1126_v23  ;;  %v1162_v61 = vpack.c.bf16 %v349_v60, %v348_v59  ;;  %v1166_v0 = vpack.c.bf16 %v351_v63, %v350_v62  ;;  %v352_v1 = vld [vmem:[#allocation8 + $0x50] sm:$0xff]  ;;  %v353_v2 = vld [vmem:[#allocation8 + $0x58] sm:$0xff]  ;;  %v354_v4 = vld [vmem:[#allocation8 + $0x60] sm:$0xff] }
  0x8c   :  { %1101 = vmatpush3.bf16.msra.mxu0 %v1098_v20  ;;  %1131 = vmatprep.subr.bf16.mxu1 %v1130_v29  ;;  %v1170_v3 = vpack.c.bf16 %v353_v2, %v352_v1  ;;  %v355_v5 = vld [vmem:[#allocation8 + $0x68] sm:$0xff]  ;;  %v762_v7 = vld [vmem:[%s1715_s2] ss:$0 sm:$0xff]  ;;  %v357_v15 = vld [vmem:[#allocation8 + $0x78] sm:$0xff] }
  0x8d   :  { %1103 = vmatprep.subr.bf16.mxu0 %v1102_v26  ;;  %v1174_v6 = vpack.c.bf16 %v355_v5, %v354_v4  ;;  %v356_v14 = vld [vmem:[#allocation8 + $0x70] sm:$0xff]  ;;  %v442_v17 = vld [vmem:[#allocation10] sm:$0xff]  ;;  %v443_v18 = vld [vmem:[#allocation10 + $0x8] sm:$0xff] }
  0x8e   :  { %v1178_v16 = vpack.c.bf16 %v357_v15, %v356_v14  ;;  %v444_v19 = vld [vmem:[#allocation10 + $0x10] sm:$0xff]  ;;  %v1182_v20 = vpack.c.bf16 %v443_v18, %v442_v17  ;;  %v445_v21 = vld [vmem:[#allocation10 + $0x18] sm:$0xff]  ;;  %v446_v23 = vld [vmem:[#allocation10 + $0x20] sm:$0xff] }
  0x8f   :  { %1133 = vmatpush3.bf16.msra.mxu1 %v1130_v29  ;;  %v1186_v22 = vpack.c.bf16 %v445_v21, %v444_v19  ;;  %v447_v24 = vld [vmem:[#allocation10 + $0x28] sm:$0xff]  ;;  %v449_v27 = vld [vmem:[#allocation10 + $0x38] sm:$0xff]  ;;  %v450_v29 = vld [vmem:[#allocation10 + $0x40] sm:$0xff] }
  0x90   :  { %1105 = vmatpush3.bf16.msra.mxu0 %v1102_v26  ;;  %1135 = vmatprep.subr.bf16.mxu1 %v1134_v35  ;;  %v1190_v25 = vpack.c.bf16 %v447_v24, %v446_v23  ;;  %v448_v26 = vld [vmem:[#allocation10 + $0x30] sm:$0xff]  ;;  %v451_v30 = vld [vmem:[#allocation10 + $0x48] sm:$0xff]  ;;  %v453_v33 = vld [vmem:[#allocation10 + $0x58] sm:$0xff] }
  0x91   :  { %1107 = vmatprep.subr.bf16.mxu0 %v1106_v32  ;;  %v1194_v28 = vpack.c.bf16 %v449_v27, %v448_v26  ;;  %v1198_v31 = vpack.c.bf16 %v451_v30, %v450_v29  ;;  %v455_v36 = vld [vmem:[#allocation10 + $0x68] sm:$0xff]  ;;  %v542_v48 = vld [vmem:[#allocation11] sm:$0xff]  ;;  %v544_v50 = vld [vmem:[#allocation11 + $0x10] sm:$0xff] }
  0x92   :  { %v545_v52 = vld [vmem:[#allocation11 + $0x18] sm:$0xff]  ;;  %v546_v54 = vld [vmem:[#allocation11 + $0x20] sm:$0xff]  ;;  %v548_v57 = vld [vmem:[#allocation11 + $0x30] sm:$0xff] }
  0x93   :  { %1137 = vmatpush3.bf16.msra.mxu1 %v1134_v35  ;;  %v454_v35 = vld [vmem:[#allocation10 + $0x60] sm:$0xff]  ;;  %v552_v63 = vld [vmem:[#allocation11 + $0x50] sm:$0xff]  ;;  %v645_v19 = vld [vmem:[#allocation13 + $0x18] sm:$0xff] }
  0x94   :  { %1109 = vmatpush3.bf16.msra.mxu0 %v1106_v32  ;;  %1139 = vmatprep.subr.bf16.mxu1 %v1138_v41  ;;  %v452_v32 = vld [vmem:[#allocation10 + $0x50] sm:$0xff]  ;;  %v1206_v37 = vpack.c.bf16 %v455_v36, %v454_v35  ;;  %v550_v60 = vld [vmem:[#allocation11 + $0x40] sm:$0xff] }
  0x95   :  { %1111 = vmatprep.subr.bf16.mxu0 %v1110_v38  ;;  %v1202_v34 = vpack.c.bf16 %v453_v33, %v452_v32  ;;  %v554_v2 = vld [vmem:[#allocation11 + $0x60] sm:$0xff]  ;;  %v764_v5 = vld [vmem:[%s1719_s6] ss:$0 sm:$0xff] }
  0x96   :  { %v642_v15 = vld [vmem:[#allocation13] sm:$0xff]  ;;  %v644_v17 = vld [vmem:[#allocation13 + $0x10] sm:$0xff] }
  0x97   :  { %1141 = vmatpush3.bf16.msra.mxu1 %v1138_v41  ;;  %v646_v21 = vld [vmem:[#allocation13 + $0x20] sm:$0xff]  ;;  %v648_v24 = vld [vmem:[#allocation13 + $0x30] sm:$0xff] }
  0x98   :  { %1113 = vmatpush3.bf16.msra.mxu0 %v1110_v38  ;;  %1143 = vmatprep.subr.bf16.mxu1 %v1142_v45  ;;  %v763_v38 = vld [vmem:[%s1717_s4] ss:$0 sm:$0xff]  ;;  %v650_v27 = vld [vmem:[#allocation13 + $0x40] sm:$0xff] }
  0x99   :  { %1115 = vmatprep.subr.bf16.mxu0 %v1114_v44  ;;  %v652_v30 = vld [vmem:[#allocation13 + $0x50] sm:$0xff]  ;;  %v654_v33 = vld [vmem:[#allocation13 + $0x60] sm:$0xff] }
  0x9a   :  { %v765_v36 = vld [vmem:[%s1721_s8] ss:$0 sm:$0xff] }
  0x9b   :  { %1145 = vmatpush3.bf16.msra.mxu1 %v1142_v45  ;;  %v456_v45 = vld [vmem:[#allocation10 + $0x70] sm:$0xff] }
  0x9c   :  { %1117 = vmatpush3.bf16.msra.mxu0 %v1114_v44  ;;  %1147 = vmatprep.subr.bf16.mxu1 %v1146_v49 }
  0x9d   :  { %1151 = vmatprep.subr.bf16.mxu0 %v1150_v53 }
  0x9f   :  { %909 = vmatmul.mubr.f32.vlgmr.msra.gmra.mrb[0].mxu0 %v141_v46  ;;  %1149 = vmatpush3.bf16.msra.mxu1 %v1146_v49  ;;  %v457_v46 = vld [vmem:[#allocation10 + $0x78] sm:$0xff]  ;;  %v543_v49 = vld [vmem:[#allocation11 + $0x8] sm:$0xff] }
  0xa0   :  { %1153 = vmatpush3.bf16.msra.mxu0 %v1150_v53  ;;  %1183 = vmatprep.subr.bf16.mxu1 %v1182_v20  ;;  %v1210_v47 = vpack.c.bf16 %v457_v46, %v456_v45  ;;  %v1214_v51 = vpack.c.bf16 %v543_v49, %v542_v48  ;;  %v1218_v53 = vpack.c.bf16 %v545_v52, %v544_v50  ;;  %v766_v46 = vld [vmem:[%s1723_s10] ss:$0 sm:$0xff]  ;;  %s1442_s10 = scalar_lea.vmem %s748_s29, 256 }
  0xa1   :  { %1155 = vmatprep.subr.bf16.mxu0 %v1154_v55  ;;  %p1443_p0 = scmp.ne.s32.totalorder %s748_s29, %s1442_s10  ;;  %p1448_p2 = scmp.lt.s32.totalorder %s1442_s10, %s1442_s10 }
  0xa3   :  { %p1449_p3 = por %p1448_p2, %p1447_p1 }
  0xa4   :  { %1157 = vmatpush3.bf16.msra.mxu0 %v1154_v55  ;;  %v547_v55 = vld [vmem:[#allocation11 + $0x28] sm:$0xff] }
  0xa5   :  { %1159 = vmatprep.subr.bf16.mxu0 %v1158_v58  ;;  %v1222_v56 = vpack.c.bf16 %v547_v55, %v546_v54  ;;  %p1450_p4 = pnand %p1449_p3, %p1443_p0 }
  0xa8   :  { %1161 = vmatpush3.bf16.msra.mxu0 %v1158_v58  ;;  %v549_v58 = vld [vmem:[#allocation11 + $0x38] sm:$0xff] }
  0xa9   :  { %1163 = vmatprep.subr.bf16.mxu0 %v1162_v61  ;;  %v1226_v59 = vpack.c.bf16 %v549_v58, %v548_v57 }
  0xac   :  { %1165 = vmatpush3.bf16.msra.mxu0 %v1162_v61  ;;  %v551_v61 = vld [vmem:[#allocation11 + $0x48] sm:$0xff] }
  0xad   :  { %1167 = vmatprep.subr.bf16.mxu0 %v1166_v0  ;;  %v1230_v62 = vpack.c.bf16 %v551_v61, %v550_v60 }
  0xb0   :  { %1169 = vmatpush3.bf16.msra.mxu0 %v1166_v0  ;;  %v553_v0 = vld [vmem:[#allocation11 + $0x58] sm:$0xff] }
  0xb1   :  { %1171 = vmatprep.subr.bf16.mxu0 %v1170_v3  ;;  %v1234_v1 = vpack.c.bf16 %v553_v0, %v552_v63 }
  0xb4   :  { %1173 = vmatpush3.bf16.msra.mxu0 %v1170_v3  ;;  %v555_v3 = vld [vmem:[#allocation11 + $0x68] sm:$0xff] }
  0xb5   :  { %1175 = vmatprep.subr.bf16.mxu0 %v1174_v6  ;;  %v1238_v4 = vpack.c.bf16 %v555_v3, %v554_v2 }
  0xb8   :  { %1177 = vmatpush3.bf16.msra.mxu0 %v1174_v6 }
  0xb9   :  { %1179 = vmatprep.subr.bf16.mxu0 %v1178_v16 }
  0xbc   :  { %1181 = vmatpush3.bf16.msra.mxu0 %v1178_v16  ;;  %v643_v16 = vld [vmem:[#allocation13 + $0x8] sm:$0xff] }
  0xbd   :  { %1215 = vmatprep.subr.bf16.mxu0 %v1214_v51  ;;  %v1246_v18 = vpack.c.bf16 %v643_v16, %v642_v15 }
 0x172   :  { %v910_v8 = vpop.f32.mrb[0].mxu0 }
 0x173   :  { %v237_v9 = vadd.f32 %v910_v8, %v762_v7  ;;  %v231_v10 = vpop.f32.mrb[1].mxu0 }
 0x174   :  { %v232_v11 = vadd.f32 %v762_v7, %v231_v10 }
 0x175   :  { %v241_v13 = vmax.f32 %v237_v9, 0.0 }
 0x176   :  { %v240_v12 = vmax.f32 %v232_v11, 0.0 }
 0x178   :  { %943 = vmatprep.mubr.f32.mxu1 %v240_v12  ;;  %v556_v12 = vld [vmem:[#allocation11 + $0x70] sm:$0xff] }
 0x179   :  { %944 = vmatmul.mubr.f32.vlgmr.msra.gmra.mrb[0].mxu1 %v241_v13  ;;  %v557_v13 = vld [vmem:[#allocation11 + $0x78] sm:$0xff] }
 0x17a   :  { %1185 = vmatpush3.bf16.msra.mxu1 %v1182_v20  ;;  %v1242_v14 = vpack.c.bf16 %v557_v13, %v556_v12  ;;  %v1250_v20 = vpack.c.bf16 %v645_v19, %v644_v17 }
 0x17b   :  { %1187 = vmatprep.subr.bf16.mxu1 %v1186_v22 }
 0x17e   :  { %1189 = vmatpush3.bf16.msra.mxu1 %v1186_v22  ;;  %v647_v22 = vld [vmem:[#allocation13 + $0x28] sm:$0xff] }
 0x17f   :  { %1191 = vmatprep.subr.bf16.mxu1 %v1190_v25  ;;  %v1254_v23 = vpack.c.bf16 %v647_v22, %v646_v21 }
 0x182   :  { %1193 = vmatpush3.bf16.msra.mxu1 %v1190_v25  ;;  %v649_v25 = vld [vmem:[#allocation13 + $0x38] sm:$0xff] }
 0x183   :  { %1195 = vmatprep.subr.bf16.mxu1 %v1194_v28  ;;  %v1258_v26 = vpack.c.bf16 %v649_v25, %v648_v24 }
 0x186   :  { %1197 = vmatpush3.bf16.msra.mxu1 %v1194_v28  ;;  %v651_v28 = vld [vmem:[#allocation13 + $0x48] sm:$0xff] }
 0x187   :  { %1199 = vmatprep.subr.bf16.mxu1 %v1198_v31  ;;  %v1262_v29 = vpack.c.bf16 %v651_v28, %v650_v27 }
 0x18a   :  { %1201 = vmatpush3.bf16.msra.mxu1 %v1198_v31  ;;  %v653_v31 = vld [vmem:[#allocation13 + $0x58] sm:$0xff] }
 0x18b   :  { %1203 = vmatprep.subr.bf16.mxu1 %v1202_v34  ;;  %v1266_v32 = vpack.c.bf16 %v653_v31, %v652_v30 }
 0x18e   :  { %1205 = vmatpush3.bf16.msra.mxu1 %v1202_v34  ;;  %v655_v34 = vld [vmem:[#allocation13 + $0x68] sm:$0xff] }
 0x18f   :  { %1207 = vmatprep.subr.bf16.mxu1 %v1206_v37  ;;  %v1270_v35 = vpack.c.bf16 %v655_v34, %v654_v33 }
 0x192   :  { %1209 = vmatpush3.bf16.msra.mxu1 %v1206_v37 }
 0x193   :  { %1211 = vmatprep.subr.bf16.mxu1 %v1210_v47 }
 0x196   :  { %1213 = vmatpush3.bf16.msra.mxu1 %v1210_v47 }
 0x197   :  { %1247 = vmatprep.subr.bf16.mxu1 %v1246_v18 }
 0x24c   :  { %v945_v39 = vpop.f32.mrb[0].mxu1 }
 0x24d   :  { %v337_v40 = vadd.f32 %v945_v39, %v763_v38  ;;  %v331_v41 = vpop.f32.mrb[1].mxu1 }
 0x24e   :  { %v332_v42 = vadd.f32 %v763_v38, %v331_v41 }
 0x24f   :  { %v341_v44 = vmax.f32 %v337_v40, 0.0 }
 0x250   :  { %v340_v43 = vmax.f32 %v332_v42, 0.0 }
 0x252   :  { %978 = vmatprep.mubr.f32.mxu0 %v340_v43  ;;  %v656_v43 = vld [vmem:[#allocation13 + $0x70] sm:$0xff] }
 0x253   :  { %979 = vmatmul.mubr.f32.vlgmr.msra.gmra.mrb[2].mxu0 %v341_v44  ;;  %v657_v44 = vld [vmem:[#allocation13 + $0x78] sm:$0xff] }
 0x254   :  { %1217 = vmatpush3.bf16.msra.mxu0 %v1214_v51  ;;  %v1274_v45 = vpack.c.bf16 %v657_v44, %v656_v43 }
 0x255   :  { %1219 = vmatprep.subr.bf16.mxu0 %v1218_v53 }
 0x258   :  { %1221 = vmatpush3.bf16.msra.mxu0 %v1218_v53  ;;  %v767_v53 = vld [vmem:[%s1725_s12] ss:$0 sm:$0xff] }
 0x259   :  { %1223 = vmatprep.subr.bf16.mxu0 %v1222_v56 }
 0x25c   :  { %1225 = vmatpush3.bf16.msra.mxu0 %v1222_v56 }
 0x25d   :  { %1227 = vmatprep.subr.bf16.mxu0 %v1226_v59 }
 0x260   :  { %1229 = vmatpush3.bf16.msra.mxu0 %v1226_v59 }
 0x261   :  { %1231 = vmatprep.subr.bf16.mxu0 %v1230_v62 }
 0x264   :  { %1233 = vmatpush3.bf16.msra.mxu0 %v1230_v62 }
 0x265   :  { %1235 = vmatprep.subr.bf16.mxu0 %v1234_v1 }
 0x268   :  { %1237 = vmatpush3.bf16.msra.mxu0 %v1234_v1 }
 0x269   :  { %1239 = vmatprep.subr.bf16.mxu0 %v1238_v4 }
 0x26c   :  { %1241 = vmatpush3.bf16.msra.mxu0 %v1238_v4 }
 0x26d   :  { %1243 = vmatprep.subr.bf16.mxu0 %v1242_v14 }
 0x270   :  { %1245 = vmatpush3.bf16.msra.mxu0 %v1242_v14 }
 0x326   :  { %v980_v6 = vpop.f32.mrb[2].mxu0 }
 0x327   :  { %v437_v7 = vadd.f32 %v980_v6, %v764_v5  ;;  %v431_v8 = vpop.f32.mrb[3].mxu0 }
 0x328   :  { %v432_v9 = vadd.f32 %v764_v5, %v431_v8 }
 0x329   :  { %v441_v11 = vmax.f32 %v437_v7, 0.0 }
 0x32a   :  { %v440_v10 = vmax.f32 %v432_v9, 0.0 }
 0x32c   :  { %1013 = vmatprep.mubr.f32.mxu1 %v440_v10 }
 0x32d   :  { %1014 = vmatmul.mubr.f32.vlgmr.msra.gmra.mrb[2].mxu1 %v441_v11 }
 0x32e   :  { %1249 = vmatpush3.bf16.msra.mxu1 %v1246_v18 }
 0x32f   :  { %1251 = vmatprep.subr.bf16.mxu1 %v1250_v20 }
 0x332   :  { %1253 = vmatpush3.bf16.msra.mxu1 %v1250_v20 }
 0x333   :  { %1255 = vmatprep.subr.bf16.mxu1 %v1254_v23 }
 0x336   :  { %1257 = vmatpush3.bf16.msra.mxu1 %v1254_v23 }
 0x337   :  { %1259 = vmatprep.subr.bf16.mxu1 %v1258_v26 }
 0x33a   :  { %1261 = vmatpush3.bf16.msra.mxu1 %v1258_v26 }
 0x33b   :  { %1263 = vmatprep.subr.bf16.mxu1 %v1262_v29 }
 0x33e   :  { %1265 = vmatpush3.bf16.msra.mxu1 %v1262_v29 }
 0x33f   :  { %1267 = vmatprep.subr.bf16.mxu1 %v1266_v32 }
 0x342   :  { %1269 = vmatpush3.bf16.msra.mxu1 %v1266_v32 }
 0x343   :  { %1271 = vmatprep.subr.bf16.mxu1 %v1270_v35 }
 0x346   :  { %1273 = vmatpush3.bf16.msra.mxu1 %v1270_v35 }
 0x347   :  { %1275 = vmatprep.subr.bf16.mxu1 %v1274_v45 }
 0x34a   :  { %1277 = vmatpush3.bf16.msra.mxu1 %v1274_v45 }
 0x400   :  { %v1015_v37 = vpop.f32.mrb[2].mxu1 }
 0x401   :  { %v537_v38 = vadd.f32 %v1015_v37, %v765_v36  ;;  %v531_v39 = vpop.f32.mrb[3].mxu1 }
 0x402   :  { %v532_v40 = vadd.f32 %v765_v36, %v531_v39 }
 0x403   :  { %v541_v42 = vmax.f32 %v537_v38, 0.0 }
 0x404   :  { %v540_v41 = vmax.f32 %v532_v40, 0.0 }
 0x406   :  { %1048 = vmatprep.mubr.f32.mxu0 %v540_v41 }
 0x407   :  { %1049 = vmatmul.mubr.f32.vlgmr.msra.gmra.mrb[4].mxu0 %v541_v42 }
 0x4da   :  { %v1050_v47 = vpop.f32.mrb[4].mxu0 }
 0x4db   :  { %v637_v48 = vadd.f32 %v1050_v47, %v766_v46  ;;  %v631_v49 = vpop.f32.mrb[5].mxu0 }
 0x4dc   :  { %v632_v50 = vadd.f32 %v766_v46, %v631_v49 }
 0x4dd   :  { %v641_v52 = vmax.f32 %v637_v48, 0.0 }
 0x4de   :  { %v640_v51 = vmax.f32 %v632_v50, 0.0 }
 0x4e0   :  { %1083 = vmatprep.mubr.f32.mxu1 %v640_v51 }
 0x4e1   :  { %1084 = vmatmul.mubr.f32.vlgmr.msra.gmra.mrb[4].mxu1 %v641_v52 }
 0x5b4   :  { %v1085_v54 = vpop.f32.mrb[4].mxu1 }
 0x5b5   :  { %v737_v55 = vadd.f32 %v1085_v54, %v767_v53  ;;  %v731_v56 = vpop.f32.mrb[5].mxu1 }
 0x5b6   :  { %v732_v57 = vadd.f32 %v767_v53, %v731_v56 }
 0x5b7   :  { %741 = vst [vmem:[#allocation14 + $0x8] sm:$0xff] %v737_v55 }
 0x5b8   :  { %740 = vst [vmem:[#allocation14] sm:$0xff] %v732_v57 }
 0x5b9   :  { %1453 = shalt.err (!%p1450_p4)
}
 0x5ba   :  { %s1454_s12 = scalar_lea.hbm %s1726_s13, 256 }
 0x5bb   :  { %p1455_p5 = scmp.ne.s32.totalorder %s1726_s13, %s1454_s12  ;;  %p1458_p6 = scmp.lt.u32.totalorder %s1454_s12, %s1726_s13 }
 0x5bd   :  { %p1460_p7 = pnand %p1458_p6, %p1455_p5 }
 0x5bf   :  { %1463 = shalt.err (!%p1460_p7)
}
 0x5c0   :  { %753 = dma.vmem_to_hbm [thread:$0]  %s748_s29, 256, %s1726_s13, [#allocation4], %s1476_s20, %s1476_s20, %s1477_s21  }
 0x5c1   :  { %1472 = dma.done.wait [#allocation4], 256  }
 0x5c2   :  { %1473 = vsyncadd [#allocation4], 4294967040 }
 0x5c3   :  { %757 = vsyncpa [#allocation3], 1 }
 0x5c4   :  { %758 = vsyncpa [#allocation6], 1 }
 0x5c5   :  { %759 = vsyncpa [#allocation9], 1 }
 0x5c6   :  { %760 = vsyncpa [#allocation12], 1 }
 0x5c7   :  { %761 = vsyncpa [#allocation4], 1 }

</bundles_post_ra>
